<compile_context>
chip_gen: v7x
topology: tpu7x:2x2x1
jax: 0.10.0
libtpu: 0.0.40
codegen_flags: <defaults>
</compile_context>

<pallas_src>
import jax
import jax.numpy as jnp
from jax.experimental import pallas as pl
from jax.experimental.pallas import tpu as pltpu


def _mish(x):
    # mish(x) = x * tanh(softplus(x)), numerically stable softplus (f32).
    sp = jnp.maximum(x, 0.0) + jnp.log1p(jnp.exp(-jnp.abs(x)))
    return x * jnp.tanh(sp)


def classifier_kernel(x_ref, w1_ref, b1_ref, w2_ref, b2_ref, o_ref):
    # x_ref:  (TILE_B, H)   bf16 CLS features for this batch tile (streamed)
    # w1_ref: (H, H)        bf16 first Linear weight (in, out), VMEM-resident
    # b1_ref: (1, H)        f32  first Linear bias
    # w2_ref: (H, CP)       bf16 second Linear weight, CP = C padded to 128
    # b2_ref: (1, CP)       f32  second Linear bias (zero-padded)
    # o_ref:  (TILE_B, CP)  f32  logits, lane-dense store
    h = jnp.dot(x_ref[...], w1_ref[...], preferred_element_type=jnp.float32)
    h = h + b1_ref[...]
    h = _mish(h)  # f32 on VPU/EUP
    out = jnp.dot(h.astype(w2_ref.dtype), w2_ref[...],
                  preferred_element_type=jnp.float32)
    out = out + b2_ref[...]
    o_ref[...] = out.astype(o_ref.dtype)


def emo_classifier(cls_hidden, w1, b1, w2, b2, *, tile_b=128):
    """Pallas wrapper: (B, H) CLS features -> (B, C) logits."""
    B, H = cls_hidden.shape
    C = w2.shape[1]
    cp = max(128, ((C + 127) // 128) * 128)  # lane-dense output width

    # Batch tiling: pad B up to a multiple of tile_b (padded rows sliced off).
    tile_b = min(tile_b, B)
    pad_b = (-B) % tile_b
    if pad_b:
        cls_hidden = jnp.pad(cls_hidden, ((0, pad_b), (0, 0)))
    Bp = B + pad_b

    # bf16 for MXU operands (halves HBM traffic, doubles MXU rate on v6e/v7x);
    # biases stay f32, accumulation is f32 via preferred_element_type.
    x = cls_hidden.astype(jnp.bfloat16)
    w1b = w1.astype(jnp.bfloat16)
    w2p = jnp.pad(w2, ((0, 0), (0, cp - C))).astype(jnp.bfloat16)
    b1r = b1.reshape(1, H).astype(jnp.float32)
    b2p = jnp.pad(b2, (0, cp - C)).reshape(1, cp).astype(jnp.float32)

    grid = (Bp // tile_b,)
    cost = pl.CostEstimate(
        flops=2 * Bp * H * H + 2 * Bp * H * cp,
        transcendentals=3 * Bp * H,
        bytes_accessed=(x.size * x.dtype.itemsize
                        + w1b.size * 2 + w2p.size * 2
                        + b1r.size * 4 + b2p.size * 4
                        + Bp * cp * 4),
    )

    out = pl.pallas_call(
        classifier_kernel,
        out_shape=jax.ShapeDtypeStruct((Bp, cp), jnp.float32),
        grid=grid,
        in_specs=[
            pl.BlockSpec((tile_b, H), lambda i: (i, 0)),  # x: streamed per tile
            pl.BlockSpec((H, H),      lambda i: (0, 0)),  # W1: resident
            pl.BlockSpec((1, H),      lambda i: (0, 0)),  # b1: resident
            pl.BlockSpec((H, cp),     lambda i: (0, 0)),  # W2: resident
            pl.BlockSpec((1, cp),     lambda i: (0, 0)),  # b2: resident
        ],
        out_specs=pl.BlockSpec((tile_b, cp), lambda i: (i, 0)),
        compiler_params=pltpu.CompilerParams(
            dimension_semantics=("parallel",)),  # v7x: shard tiles over 2 TCs
        cost_estimate=cost,
    )(x, w1b, b1r, w2p, b2p)

    return out[:B, :C]


def base_model_stub(X, attention_mask, embed_table):
    """Deterministic stand-in for the external base_model (plain-JAX glue).

    Returns a tuple whose first element is (B, S, H) hidden states, mirroring
    HuggingFace-style `hidden_states[0]`.
    """
    hs = embed_table[X]                                   # (B, S, H)
    hs = hs * attention_mask[..., None].astype(hs.dtype)  # mask gate
    return (hs,)


def emo_model_forward(inputs, params):
    X, attention_mask = inputs
    hidden_states = base_model_stub(X, attention_mask, params["embed"])
    cls = hidden_states[0][:, 0, :]                       # (B, H)
    return emo_classifier(cls, params["w1"], params["b1"],
                          params["w2"], params["b2"])


def reference_forward(inputs, params):
    """Pure-JAX reference with matching bf16/f32 numerics (correctness check)."""
    X, attention_mask = inputs
    hs = base_model_stub(X, attention_mask, params["embed"])[0]
    cls = hs[:, 0, :]
    w1b = params["w1"].astype(jnp.bfloat16)
    w2b = params["w2"].astype(jnp.bfloat16)
    h = jnp.dot(cls.astype(jnp.bfloat16), w1b,
                preferred_element_type=jnp.float32) + params["b1"]
    h = _mish(h)
    out = jnp.dot(h.astype(jnp.bfloat16), w2b,
                  preferred_element_type=jnp.float32) + params["b2"]
    return out


if __name__ == "__main__":
    # Small shapes consistent with the forward pass (batch sized to exercise
    # two batch tiles of 128 rows each).
    B, S, H, C, VOCAB = 256, 8, 256, 16, 32

    key = jax.random.PRNGKey(0)
    k_emb, k_tok, k_w1, k_w2 = jax.random.split(key, 4)

    # Linear weights ~ N(0, 0.02), biases zero (matches the module's __init__).
    params = {
        "embed": jax.random.normal(k_emb, (VOCAB, H), jnp.float32) * 0.1,
        "w1": jax.random.normal(k_w1, (H, H), jnp.float32) * 0.02,
        "b1": jnp.zeros((H,), jnp.float32),
        "w2": jax.random.normal(k_w2, (H, C), jnp.float32) * 0.02,
        "b2": jnp.zeros((C,), jnp.float32),
    }

    # Example inputs: token ids + attention mask (last two positions padded).
    X = jax.random.randint(k_tok, (B, S), 0, VOCAB, jnp.int32)
    attention_mask = jnp.concatenate(
        [jnp.ones((B, S - 2), jnp.int32), jnp.zeros((B, 2), jnp.int32)], axis=1)

    out = emo_model_forward((X, attention_mask), params)
    out = jax.block_until_ready(out)

    ref = reference_forward((X, attention_mask), params)
    assert out.shape == (B, C)
    assert jnp.allclose(out, ref, atol=1e-4, rtol=1e-3), (
        float(jnp.max(jnp.abs(out - ref))))

    print("KERNEL_OK")
</pallas_src>

<mosaic_0001>
module attributes {stable_mosaic.version = 11 : i64} {
  func.func @classifier_kernel(%arg0: i32, %arg1: memref<128x256xbf16, #tpu.memory_space<vmem>>, %arg2: memref<256x256xbf16, #tpu.memory_space<vmem>>, %arg3: memref<1x256xf32, #tpu.memory_space<vmem>>, %arg4: memref<256x128xbf16, #tpu.memory_space<vmem>>, %arg5: memref<1x128xf32, #tpu.memory_space<vmem>>, %arg6: memref<128x128xf32, #tpu.memory_space<vmem>>) attributes {dimension_semantics = [#tpu.dimension_semantics<parallel>], iteration_bounds = array<i64: 2>, scalar_prefetch = 0 : i64, scratch_operands = 0 : i64, tpu.core_type = #tpu.core_type<tc>, window_params = [{transform_indices = @transform_0, window_bounds = array<i64: 128, 256>}, {pipeline_mode = #tpu.pipeline_mode<synchronous>, transform_indices = @transform_1, window_bounds = array<i64: 256, 256>}, {pipeline_mode = #tpu.pipeline_mode<synchronous>, transform_indices = @transform_2, window_bounds = array<i64: 1, 256>}, {pipeline_mode = #tpu.pipeline_mode<synchronous>, transform_indices = @transform_3, window_bounds = array<i64: 256, 128>}, {pipeline_mode = #tpu.pipeline_mode<synchronous>, transform_indices = @transform_4, window_bounds = array<i64: 1, 128>}, {transform_indices = @transform_5, window_bounds = array<i64: 128, 128>}]} {
    %c0 = arith.constant 0 : index
    %c0_0 = arith.constant 0 : index
    %0 = vector.load %arg1[%c0, %c0_0] : memref<128x256xbf16, #tpu.memory_space<vmem>>, vector<128x256xbf16>
    %c0_1 = arith.constant 0 : index
    %c0_2 = arith.constant 0 : index
    %1 = vector.load %arg2[%c0_1, %c0_2] : memref<256x256xbf16, #tpu.memory_space<vmem>>, vector<256x256xbf16>
    %cst = arith.constant dense<0.000000e+00> : vector<128x256xf32>
    %2 = tpu.matmul %0, %1, %cst {dimension_numbers = #tpu.dot_dimension_numbers<[1], [0], [0], [1], [0, 0, 1, 1], [], []>} : vector<128x256xbf16>, vector<256x256xbf16>, vector<128x256xf32> -> vector<128x256xf32>
    %c0_3 = arith.constant 0 : index
    %c0_4 = arith.constant 0 : index
    %3 = vector.load %arg3[%c0_3, %c0_4] : memref<1x256xf32, #tpu.memory_space<vmem>>, vector<1x256xf32>
    %4 = vector.broadcast %3 : vector<1x256xf32> to vector<128x256xf32>
    %5 = arith.addf %2, %4 : vector<128x256xf32>
    %cst_5 = arith.constant 0.000000e+00 : f32
    %6 = vector.broadcast %cst_5 : f32 to vector<128x256xf32>
    %7 = arith.maximumf %5, %6 : vector<128x256xf32>
    %8 = math.absf %5 : vector<128x256xf32>
    %cst_6 = arith.constant 0.000000e+00 : f32
    %9 = vector.broadcast %cst_6 : f32 to vector<128x256xf32>
    %10 = arith.subf %9, %8 : vector<128x256xf32>
    %11 = math.exp %10 : vector<128x256xf32>
    %12 = math.log1p %11 : vector<128x256xf32>
    %13 = arith.addf %7, %12 : vector<128x256xf32>
    %14 = math.tanh %13 : vector<128x256xf32>
    %15 = arith.mulf %5, %14 : vector<128x256xf32>
    %16 = arith.truncf %15 : vector<128x256xf32> to vector<128x256xbf16>
    %c0_7 = arith.constant 0 : index
    %c0_8 = arith.constant 0 : index
    %17 = vector.load %arg4[%c0_7, %c0_8] : memref<256x128xbf16, #tpu.memory_space<vmem>>, vector<256x128xbf16>
    %cst_9 = arith.constant dense<0.000000e+00> : vector<128x128xf32>
    %18 = tpu.matmul %16, %17, %cst_9 {dimension_numbers = #tpu.dot_dimension_numbers<[1], [0], [0], [1], [0, 0, 1, 1], [], []>} : vector<128x256xbf16>, vector<256x128xbf16>, vector<128x128xf32> -> vector<128x128xf32>
    %c0_10 = arith.constant 0 : index
    %c0_11 = arith.constant 0 : index
    %19 = vector.load %arg5[%c0_10, %c0_11] : memref<1x128xf32, #tpu.memory_space<vmem>>, vector<1x128xf32>
    %20 = vector.broadcast %19 : vector<1x128xf32> to vector<128x128xf32>
    %21 = arith.addf %18, %20 : vector<128x128xf32>
    %c0_12 = arith.constant 0 : index
    %c0_13 = arith.constant 0 : index
    %22 = vector.load %arg6[%c0_12, %c0_13] : memref<128x128xf32, #tpu.memory_space<vmem>>, vector<128x128xf32>
    tpu.vector_store %arg6[%c0_12, %c0_13], %21 {strides = array<i32>} : memref<128x128xf32, #tpu.memory_space<vmem>>, vector<128x128xf32>,
    return
  }
  func.func @transform_0(%arg0: i32) -> (i32, i32) {
    %c0_i32 = arith.constant 0 : i32
    %c0_i32_0 = arith.constant 0 : i32
    return %arg0, %c0_i32 : i32, i32
  }
  func.func @transform_1(%arg0: i32) -> (i32, i32) {
    %c0_i32 = arith.constant 0 : i32
    %c0_i32_0 = arith.constant 0 : i32
    %c0_i32_1 = arith.constant 0 : i32
    return %c0_i32, %c0_i32_0 : i32, i32
  }
  func.func @transform_2(%arg0: i32) -> (i32, i32) {
    %c0_i32 = arith.constant 0 : i32
    %c0_i32_0 = arith.constant 0 : i32
    %c0_i32_1 = arith.constant 0 : i32
    return %c0_i32, %c0_i32_0 : i32, i32
  }
  func.func @transform_3(%arg0: i32) -> (i32, i32) {
    %c0_i32 = arith.constant 0 : i32
    %c0_i32_0 = arith.constant 0 : i32
    %c0_i32_1 = arith.constant 0 : i32
    return %c0_i32, %c0_i32_0 : i32, i32
  }
  func.func @transform_4(%arg0: i32) -> (i32, i32) {
    %c0_i32 = arith.constant 0 : i32
    %c0_i32_0 = arith.constant 0 : i32
    %c0_i32_1 = arith.constant 0 : i32
    return %c0_i32, %c0_i32_0 : i32, i32
  }
  func.func @transform_5(%arg0: i32) -> (i32, i32) {
    %c0_i32 = arith.constant 0 : i32
    %c0_i32_0 = arith.constant 0 : i32
    return %arg0, %c0_i32 : i32, i32
  }
}

</mosaic_0001>

<bundles_post_ra>
// kernel: tpu_custom_call.1
= control target key start
LH: loop header
LB: loop body
LE: loop exit
PB: predicated region body
PF: predicated region fallthrough
CT: control target
= control target key end

     0   :  { %10 = vsyncpa [#allocation3], 0  ;;  %s3303_s0 = inlined_call_operand.hbm [shape: bf16[256,256], index: 0, kind: input, shape index: {}]   ;;  %s3304_s1 = inlined_call_operand.hbm [shape: bf16[256,256], index: 1, kind: input, shape index: {}]   ;;  %s3305_s2 = inlined_call_operand.vmem [shape: f32[1,256], index: 2, kind: input, shape index: {}]   ;;  %s3306_s3 = inlined_call_operand.hbm [shape: bf16[256,128], index: 3, kind: input, shape index: {}]   ;;  %s3307_s4 = inlined_call_operand.vmem [shape: f32[1,128], index: 4, kind: input, shape index: {}]   ;;  %s3308_s5 = inlined_call_operand.hbm [shape: f32[256,128], index: 5, kind: output, shape index: {}]  }
   0x1   :  { %12 = vsyncpa [#allocation3 + $0x1], 0 }
   0x2   :  { %13 = vsyncpa [#allocation6], 0 }
   0x3   :  { %14 = vsyncpa [#allocation4], 0 }
   0x4   :  { %16 = vsyncpa [#allocation4 + $0x1], 0  ;;  %s2305_s18 = smov 0   ;;  %s2307_s19 = smov 0  }
   0x5   :  { %s2309_s20 = smov 0   ;;  %s2311_s21 = smov 0  }
   0x6 LB: > { %s2326_s22 = sadd.s32 4294967295, %s2263_s21   ;;  %s1603_s23 = sadd.s32 4294967294, %s2263_s21   ;;  %s2263_s21 = sphi %s2311_s21, %s3403_s21   ;;  %s2259_s20 = sphi %s2309_s20, %s3402_s20   ;;  %s2255_s19 = sphi %s2307_s19, %s3401_s19   ;;  %s2251_s18 = sphi %s2305_s18, %s3400_s18  }
   0x7   : > { %p42_p0 = scmp.ne.s32.totalorder %s2255_s19, %s2251_s18  ;;  %p3309_p1 = scmp.eq.s32.totalorder %s2326_s22, 0 }
   0x8   : > { %p156_p3 = scmp.eq.s32.totalorder %s1603_s23, 1  ;;  %p1604_p5 = scmp.ge.s32.totalorder %s2263_s21, 1 }
   0x9   : > { %p2335_p4 = por %p3309_p1, %p42_p0  ;;  %p163_p7 = scmp.lt.s32.totalorder %s2263_s21, 3 }
   0xa   : > { %p2340_p6 = por %p156_p3, %p42_p0  ;;  %s2265_s27 = smov [#allocation5]  }
   0xb   : > { %s3312_s24 = scalar_select %p2335_p4, 1, 0 }
   0xc   : > { %s3313_s25 = scalar_select %p2340_p6, 1, 0 }
   0xd   : > { %p2345_p8 = pnand %p1604_p5, %p163_p7  ;;  %s175_s28 = sshll.u32 %s2265_s27, 4  ;;  %s2349_s28 = int_to_ptr.vmem [resolvable:$true] %s175_s28 }
   0xe   : > { %s2266_s30 = smov [#allocation7]   ;;  %s2107_s9 = scalar_lea.hbm %s3304_s1, 4096 }
   0xf   : > { %p1766_p9 = pneg %p2345_p8  ;;  %s191_s6 = sshll.u32 %s2266_s30, 4  ;;  %s2360_s6 = int_to_ptr.vmem [resolvable:$true] %s191_s6 }
  0x10   : > { %p2108_p12 = scmp.ne.s32.totalorder %s3304_s1, %s2107_s9  ;;  %p2114_p5 = scmp.lt.u32.totalorder %s2107_s9, %s3304_s1 }
  0x11   : > { %p2356_p11 = pnand %p1766_p9, %p3309_p1 }
  0x13   : > { %p2109_p13 = pneg %p2356_p11 }
  0x15   : > { %p2110_p0 = pnand %p2109_p13, %p2108_p12 }
  0x17   : > { %p2111_p3 = pneg %p2110_p0 }
  0x19   : > { %p2116_p7 = pnand %p2114_p5, %p2111_p3 }
  0x1b   : > { %2119 = shalt.err (!%p2116_p7)
}
  0x1c   : > { %s2120_s14 = scalar_lea.vmem %s2349_s28, 4096  ;;  %p2128_p2 = scmp.lt.s32.totalorder %s2349_s28, %s2349_s28 }
  0x1d   : > { %p2121_p9 = scmp.ne.s32.totalorder %s2349_s28, %s2120_s14  ;;  %p2129_p12 = scmp.lt.s32.totalorder %s2120_s14, %s2120_s14 }
  0x1f   : > { %p2123_p10 = pnand %p2121_p9, %p2109_p13  ;;  %p2130_p0 = por %p2129_p12, %p2128_p2 }
  0x21   : > { %p2124_p1 = pneg %p2123_p10 }
  0x23   : > { %p2131_p6 = pnand %p2130_p0, %p2124_p1 }
  0x25   : > { %2134 = shalt.err (!%p2131_p6)
}
  0x26   : > { %s2267_s15 = smov 128   ;;  %s2268_s16 = smov 8  }
  0x27   : > { %1769 = dma.hbm_to_vmem [thread:$0]  (!%p2356_p11), %s3304_s1, 4096, %s2349_s28, [#allocation6], %s2267_s15, %s2267_s15, %s2268_s16  }
  0x28   : > { %s2135_s7 = scalar_lea.hbm %s3306_s3, 2048 }
  0x29   : > { %p2136_p1 = scmp.ne.s32.totalorder %s3306_s3, %s2135_s7  ;;  %p2142_p10 = scmp.lt.u32.totalorder %s2135_s7, %s3306_s3 }
  0x2b   : > { %p2138_p2 = pnand %p2136_p1, %p2109_p13 }
  0x2d   : > { %p2139_p6 = pneg %p2138_p2 }
  0x2f   : > { %p2144_p3 = pnand %p2142_p10, %p2139_p6 }
  0x31   : > { %2147 = shalt.err (!%p2144_p3)
}
  0x32   : > { %s2148_s28 = scalar_lea.vmem %s2360_s6, 2048  ;;  %p2156_p12 = scmp.lt.s32.totalorder %s2360_s6, %s2360_s6 }
  0x33   : > { %p2149_p5 = scmp.ne.s32.totalorder %s2360_s6, %s2148_s28  ;;  %p2157_p0 = scmp.lt.s32.totalorder %s2148_s28, %s2148_s28 }
  0x35   : > { %p2151_p7 = pnand %p2149_p5, %p2109_p13  ;;  %p2158_p1 = por %p2157_p0, %p2156_p12 }
  0x37   : > { %p2152_p9 = pneg %p2151_p7 }
  0x39   : > { %p2159_p2 = pnand %p2158_p1, %p2152_p9 }
  0x3b   : > { %2162 = shalt.err (!%p2159_p2)
}
  0x3c   : > { %s2269_s12 = smov 64   ;;  %s2270_s13 = smov 4  }
  0x3d   : > { %1772 = dma.hbm_to_vmem [thread:$0]  (!%p2356_p11), %s3306_s3, 2048, %s2360_s6, [#allocation6], %s2269_s12, %s2269_s12, %s2270_s13  }
  0x3e   : > { %s2418_s23 = sadd.s32 1, %s2263_s21   ;;  %s29_s30 = sadd.s32 1, %s2259_s20 }
  0x3f   : > { %s26_s27 = ssub.s32 %s2263_s21, %s2418_s23  ;;  %p36_p6 = scmp.ne.s32.totalorder %s2259_s20, %s2255_s19 }
  0x40   : > { %p27_p13 = scmp.eq.s32.totalorder %s26_s27, 0  ;;  %p37_p10 = scmp.eq.s32.totalorder %s2263_s21, 0 }
  0x41   : > { %p3316_p5 = scmp.eq.s32.totalorder %s2326_s22, 1  ;;  %p1783_p9 = scmp.lt.s32.totalorder %s2263_s21, 2 }
  0x42   : > { %s2427_s7 = scalar_select %p27_p13, %s2259_s20, %s29_s30  }
  0x43   : > { %p38_p3 = por %p37_p10, %p36_p6  ;;  %p2431_p7 = por %p3316_p5, %p36_p6 }
  0x44   : > { %s208_s29 = sand.u32 1, %s2259_s20   ;;  %s1688_s6 = sshll.u32 %s2263_s21, 11 }
  0x45   : > { %s3317_s8 = scalar_select %p2431_p7, 1, 0 }
  0x46   : > { %s1608_s9 = sshll.u32 %s208_s29, 7  ;;  %s2441_s28 = scalar_lea.hbm %s3303_s0, %s1688_s6 }
  0x47   : > { %s212_s12 = scalar_lea.vmem [#allocation2], %s1608_s9  ;;  %p2445_p11 = pnand %p1783_p9, %p38_p3 }
  0x48   : > { %s220_s13 = sshll.u32 %s212_s12, 4  ;;  %s2449_s17 = scalar_lea.sflag [#allocation3], %s208_s29  ;;  %s2443_s13 = int_to_ptr.vmem [resolvable:$true] %s220_s13 }
  0x49   : > { %s2163_s27 = scalar_lea.hbm %s2441_s28, 2048  ;;  %p2165_p0 = pneg %p2445_p11 }
  0x4a   : > { %p2164_p12 = scmp.ne.s32.totalorder %s2441_s28, %s2163_s27  ;;  %s2168_s6 = scalar_lea.hbm %s3303_s0, 4096 }
  0x4b   : > { %p2169_p13 = scmp.lt.u32.totalorder %s2441_s28, %s3303_s0  ;;  %p2170_p6 = scmp.lt.u32.totalorder %s2168_s6, %s2163_s27 }
  0x4c   : > { %p2166_p1 = pnand %p2165_p0, %p2164_p12  ;;  %p2172_p3 = scmp.lt.u32.totalorder %s2163_s27, %s2441_s28 }
  0x4d   : > { %p2171_p10 = por %p2170_p6, %p2169_p13 }
  0x4e   : > { %p2167_p2 = pneg %p2166_p1 }
  0x4f   : > { %p2173_p5 = por %p2172_p3, %p2171_p10 }
  0x51   : > { %p2174_p9 = pnand %p2173_p5, %p2167_p2 }
  0x53   : > { %2177 = shalt.err (!%p2174_p9)
}
  0x54   : > { %s2178_s29 = scalar_lea.vmem %s2443_s13, 2048  ;;  %s2271_s12 = smov [#allocation2]  }
  0x55   : > { %p2179_p12 = scmp.ne.s32.totalorder %s2443_s13, %s2178_s29  ;;  %s2183_s30 = sshll.u32 %s2271_s12, 4  ;;  %s2184_s30 = int_to_ptr.vmem [resolvable:$false] %s2183_s30 }
  0x56   : > { %s2185_s9 = scalar_lea.vmem %s2184_s30, 4096  ;;  %p2186_p4 = scmp.lt.s32.totalorder %s2443_s13, %s2184_s30 }
  0x57   : > { %p2181_p1 = pnand %p2179_p12, %p2165_p0  ;;  %p2187_p13 = scmp.lt.s32.totalorder %s2185_s9, %s2178_s29 }
  0x59   : > { %p2182_p7 = pneg %p2181_p1  ;;  %p2188_p6 = por %p2187_p13, %p2186_p4 }
  0x5b   : > { %p2189_p10 = pnand %p2188_p6, %p2182_p7 }
  0x5d   : > { %2192 = shalt.err (!%p2189_p10)
}
  0x5e   : > { %1776 = dma.hbm_to_vmem [thread:$0]  (!%p2445_p11), %s2441_s28, 2048, %s2443_s13, %s2449_s17, %s2267_s15, %s2267_s15, %s2268_s16  }
  0x5f   : > { %232 = sbr.rel (%p2345_p8) target bundleno = 801 (0x321), region = 40 }
  0x66   : > { %s2483_s27 = sand.u32 1, %s2255_s19   ;;  %p3319_p4 = scmp.ne.s32.totalorder %s3312_s24, 0 }
  0x67   : > { %s1613_s6 = sshll.u32 %s2483_s27, 7  ;;  %s235_s10 = scalar_lea.sflag [#allocation3], %s2483_s27 }
  0x68   : > { %s2489_s14 = scalar_lea.vmem [#allocation2], %s1613_s6 }
  0x69   : > { %2238 = dma.done.wait (%p3319_p4), %s235_s10, 2048  }
  0x6a   : > { %2240 = vsyncadd (%p3319_p4), %s235_s10, 4294965248  ;;  %p3320_p7 = scmp.eq.s32.totalorder %s2326_s22, 0 }
  0x6c   : > { %2242 = dma.done.wait (%p3320_p7), [#allocation6], 6144   ;;  %p3321_p8 = pmov %p3320_p7 }
  0x6d   : > { %v1827_v0 = vld [vmem:[#allocation5 + $0x4] ss:$8 sps:$4 sm:$0xff]   ;;  %v1829_v1 = vld [vmem:[#allocation5] ss:$8 sps:$4 sm:$0xff]   ;;  %v1830_v2 = vld [vmem:[#allocation5 + $0x14] ss:$8 sps:$4 sm:$0xff]   ;;  %v326_v62 = vlaneseq }
  0x6e   : > { %2244 = vsyncadd (%p3321_p8), [#allocation6], 4294961152  ;;  %576 = vmatprep.subr.bf16.mxu0 %v1827_v0  ;;  %v1832_v3 = vld [vmem:[#allocation5 + $0x10] ss:$8 sps:$4 sm:$0xff]   ;;  %v1833_v4 = vld [vmem:[#allocation5 + $0x24] ss:$8 sps:$4 sm:$0xff]  }
  0x6f   : > { %577 = vmatpush1.bf16.msra.mxu0 %v1829_v1  ;;  %v1835_v5 = vld [vmem:[#allocation5 + $0x20] ss:$8 sps:$4 sm:$0xff]   ;;  %v1836_v6 = vld [vmem:[#allocation5 + $0x34] ss:$8 sps:$4 sm:$0xff]   ;;  %v1838_v7 = vld [vmem:[#allocation5 + $0x30] ss:$8 sps:$4 sm:$0xff]  }
  0x70   : > { %578 = vmatprep.subr.bf16.mxu0 %v1830_v2  ;;  %v1839_v8 = vld [vmem:[#allocation5 + $0x44] ss:$8 sps:$4 sm:$0xff]   ;;  %v1841_v9 = vld [vmem:[#allocation5 + $0x40] ss:$8 sps:$4 sm:$0xff]   ;;  %v1842_v10 = vld [vmem:[#allocation5 + $0x54] ss:$8 sps:$4 sm:$0xff]  }
  0x71   : > { %v1844_v11 = vld [vmem:[#allocation5 + $0x50] ss:$8 sps:$4 sm:$0xff]   ;;  %v1845_v12 = vld [vmem:[#allocation5 + $0x64] ss:$8 sps:$4 sm:$0xff]   ;;  %v1847_v14 = vld [vmem:[#allocation5 + $0x60] ss:$8 sps:$4 sm:$0xff]  }
  0x72   : > { %v1877_v13 = vld [vmem:[%s2489_s14 + $0x4] ss:$8 sps:$4 sm:$0xff]   ;;  %v1848_v15 = vld [vmem:[#allocation5 + $0x74] ss:$8 sps:$4 sm:$0xff]   ;;  %v1850_v16 = vld [vmem:[#allocation5 + $0x70] ss:$8 sps:$4 sm:$0xff]  }
  0x73   : > { %579 = vmatpush1.bf16.msra.mxu0 %v1832_v3  ;;  %608 = vmatprep.mubr.bf16.mxu0 %v1877_v13  ;;  %v1851_v17 = vld [vmem:[#allocation5 + $0x84] ss:$8 sps:$4 sm:$0xff]   ;;  %v1853_v18 = vld [vmem:[#allocation5 + $0x80] ss:$8 sps:$4 sm:$0xff]   ;;  %v1854_v19 = vld [vmem:[#allocation5 + $0x94] ss:$8 sps:$4 sm:$0xff]  }
  0x74   : > { %580 = vmatprep.subr.bf16.mxu0 %v1833_v4  ;;  %v1856_v20 = vld [vmem:[#allocation5 + $0x90] ss:$8 sps:$4 sm:$0xff]   ;;  %v1857_v21 = vld [vmem:[#allocation5 + $0xa4] ss:$8 sps:$4 sm:$0xff]   ;;  %v1859_v22 = vld [vmem:[#allocation5 + $0xa0] ss:$8 sps:$4 sm:$0xff]  }
  0x75   : > { %v1860_v23 = vld [vmem:[#allocation5 + $0xb4] ss:$8 sps:$4 sm:$0xff]   ;;  %v1862_v24 = vld [vmem:[#allocation5 + $0xb0] ss:$8 sps:$4 sm:$0xff]   ;;  %v1863_v25 = vld [vmem:[#allocation5 + $0xc4] ss:$8 sps:$4 sm:$0xff]  }
  0x76   : > { %v1865_v26 = vld [vmem:[#allocation5 + $0xc0] ss:$8 sps:$4 sm:$0xff]   ;;  %v1866_v27 = vld [vmem:[#allocation5 + $0xd4] ss:$8 sps:$4 sm:$0xff]   ;;  %v1868_v28 = vld [vmem:[#allocation5 + $0xd0] ss:$8 sps:$4 sm:$0xff]  }
  0x77   : > { %581 = vmatpush1.bf16.msra.mxu0 %v1835_v5  ;;  %v1869_v29 = vld [vmem:[#allocation5 + $0xe4] ss:$8 sps:$4 sm:$0xff]   ;;  %v1871_v30 = vld [vmem:[#allocation5 + $0xe0] ss:$8 sps:$4 sm:$0xff]   ;;  %v1872_v31 = vld [vmem:[#allocation5 + $0xf4] ss:$8 sps:$4 sm:$0xff]  }
  0x78   : > { %582 = vmatprep.subr.bf16.mxu0 %v1836_v6  ;;  %v1874_v32 = vld [vmem:[#allocation5 + $0xf0] ss:$8 sps:$4 sm:$0xff]   ;;  %v1875_v33 = vld [vmem:[%s2489_s14] ss:$8 sps:$4 sm:$0xff]   ;;  %v1878_v34 = vld [vmem:[%s2489_s14 + $0x14] ss:$8 sps:$4 sm:$0xff]  }
  0x79   : > { %v1880_v35 = vld [vmem:[%s2489_s14 + $0x10] ss:$8 sps:$4 sm:$0xff]   ;;  %v1881_v36 = vld [vmem:[%s2489_s14 + $0x24] ss:$8 sps:$4 sm:$0xff]   ;;  %v1883_v37 = vld [vmem:[%s2489_s14 + $0x20] ss:$8 sps:$4 sm:$0xff]  }
  0x7a   : > { %v1884_v38 = vld [vmem:[%s2489_s14 + $0x34] ss:$8 sps:$4 sm:$0xff]   ;;  %v1886_v39 = vld [vmem:[%s2489_s14 + $0x30] ss:$8 sps:$4 sm:$0xff]   ;;  %v1887_v40 = vld [vmem:[%s2489_s14 + $0x44] ss:$8 sps:$4 sm:$0xff]  }
  0x7b   : > { %583 = vmatpush1.bf16.msra.mxu0 %v1838_v7  ;;  %v1889_v41 = vld [vmem:[%s2489_s14 + $0x40] ss:$8 sps:$4 sm:$0xff]   ;;  %v1890_v42 = vld [vmem:[%s2489_s14 + $0x54] ss:$8 sps:$4 sm:$0xff]   ;;  %v1892_v43 = vld [vmem:[%s2489_s14 + $0x50] ss:$8 sps:$4 sm:$0xff]  }
  0x7c   : > { %584 = vmatprep.subr.bf16.mxu0 %v1839_v8  ;;  %v1893_v44 = vld [vmem:[%s2489_s14 + $0x64] ss:$8 sps:$4 sm:$0xff]   ;;  %v1895_v45 = vld [vmem:[%s2489_s14 + $0x60] ss:$8 sps:$4 sm:$0xff]   ;;  %v1896_v46 = vld [vmem:[%s2489_s14 + $0x74] ss:$8 sps:$4 sm:$0xff]  }
  0x7d   : > { %v1898_v47 = vld [vmem:[%s2489_s14 + $0x70] ss:$8 sps:$4 sm:$0xff]   ;;  %v1899_v48 = vld [vmem:[#allocation7 + $0x40] sm:$0xff]   ;;  %v1901_v50 = vld [vmem:[#allocation7 + $0x48] sm:$0xff]   ;;  %v327_v1 = vshrl.u32 %v326_v62, 7  ;;  %s3219_s28 = scalar_lea.vmem [#allocation8], %s1613_s6 }
  0x7e   : > { %1690 = vmatprep.subr.bf16.mxu1 %v1899_v48  ;;  %v1900_v49 = vld [vmem:[#allocation7] sm:$0xff]   ;;  %v1902_v51 = vld [vmem:[#allocation7 + $0x8] sm:$0xff]   ;;  %v1903_v52 = vld [vmem:[#allocation7 + $0x50] sm:$0xff]   ;;  %s1689_s13 = sshll.u32 %s2326_s22, 11  ;;  %s1511_s17 = sshll.u32 %s3219_s28, 4  ;;  %s3256_s17 = int_to_ptr.vmem [resolvable:$true] %s1511_s17 }
  0x7f   : > { %585 = vmatpush1.bf16.msra.mxu0 %v1841_v9  ;;  %1691 = vmatpush3.bf16.msra.mxu1 %v1900_v49  ;;  %v1904_v53 = vld [vmem:[#allocation7 + $0x10] sm:$0xff]   ;;  %v1905_v54 = vld [vmem:[#allocation7 + $0x58] sm:$0xff]   ;;  %v1907_v56 = vld [vmem:[#allocation7 + $0x60] sm:$0xff]   ;;  %v328_v2 = vsub.s32 0, %v327_v1  ;;  %v332_v4 = vsub.s32 1, %v327_v1  ;;  %s3254_s12 = scalar_lea.hbm %s3308_s5, %s1689_s13  ;;  %s1498_s22 = scalar_lea.sflag [#allocation4], %s2483_s27 }
  0x80   : > { %586 = vmatprep.subr.bf16.mxu0 %v1842_v10  ;;  %1692 = vmatprep.subr.bf16.mxu1 %v1901_v50  ;;  %v1906_v55 = vld [vmem:[#allocation7 + $0x18] sm:$0xff]   ;;  %v1908_v57 = vld [vmem:[#allocation7 + $0x20] sm:$0xff]   ;;  %v1909_v58 = vld [vmem:[#allocation7 + $0x68] sm:$0xff]   ;;  %s2193_s30 = scalar_lea.vmem %s3256_s17, 2048  ;;  %p3397_p0 = scmp.ne.s32.totalorder %s3317_s8, 0 }
  0x81   : > { %v1910_v59 = vld [vmem:[#allocation7 + $0x28] sm:$0xff]   ;;  %v1911_v60 = vld [vmem:[#allocation7 + $0x70] sm:$0xff]   ;;  %v1913_v63 = vld [vmem:[#allocation7 + $0x78] sm:$0xff]   ;;  %p2194_p11 = scmp.ne.s32.totalorder %s3256_s17, %s2193_s30  ;;  %s2272_s9 = smov [#allocation8]  }
  0x82   : > { %v1912_v61 = vld [vmem:[#allocation7 + $0x30] sm:$0xff]   ;;  %v1914_v0 = vld [vmem:[#allocation7 + $0x38] sm:$0xff]   ;;  %v324_v3 = vld [vmem:[%s3305_s2] sm:$0x3]  ;;  %s2197_s6 = sshll.u32 %s2272_s9, 4  ;;  %s2198_s6 = int_to_ptr.vmem [resolvable:$false] %s2197_s6 }
  0x83   : > { %587 = vmatpush1.bf16.msra.mxu0 %v1844_v11  ;;  %1693 = vmatpush3.bf16.msra.mxu1 %v1902_v51  ;;  %v2518_v5 = vrot.slane %v324_v3, %v328_v2  ;;  %v2520_v6 = vrot.slane %v324_v3, %v332_v4  ;;  %p2195_p2 = pnand %p2194_p11, %p3397_p0  ;;  %s2199_s10 = scalar_lea.vmem %s2198_s6, 4096 }
  0x84   : > { %588 = vmatprep.subr.bf16.mxu0 %v1845_v12  ;;  %1694 = vmatprep.subr.bf16.mxu1 %v1903_v52  ;;  %p2200_p5 = scmp.lt.s32.totalorder %s3256_s17, %s2198_s6  ;;  %p2201_p9 = scmp.lt.s32.totalorder %s2199_s10, %s2193_s30 }
  0x85   : > { %p2196_p3 = pneg %p2195_p2 }
  0x86   : > { %p2202_p12 = por %p2201_p9, %p2200_p5 }
  0x87   : > { %589 = vmatpush1.bf16.msra.mxu0 %v1847_v14  ;;  %1695 = vmatpush3.bf16.msra.mxu1 %v1904_v53 }
  0x88   : > { %590 = vmatprep.subr.bf16.mxu0 %v1848_v15  ;;  %1696 = vmatprep.subr.bf16.mxu1 %v1905_v54  ;;  %p2203_p1 = pnand %p2202_p12, %p2196_p3 }
  0x8b   : > { %591 = vmatpush1.bf16.msra.mxu0 %v1850_v16  ;;  %1697 = vmatpush3.bf16.msra.mxu1 %v1906_v55 }
  0x8c   : > { %592 = vmatprep.subr.bf16.mxu0 %v1851_v17  ;;  %1698 = vmatprep.subr.bf16.mxu1 %v1907_v56 }
  0x8f   : > { %593 = vmatpush1.bf16.msra.mxu0 %v1853_v18  ;;  %1699 = vmatpush3.bf16.msra.mxu1 %v1908_v57 }
  0x90   : > { %594 = vmatprep.subr.bf16.mxu0 %v1854_v19  ;;  %1700 = vmatprep.subr.bf16.mxu1 %v1909_v58 }
  0x93   : > { %595 = vmatpush1.bf16.msra.mxu0 %v1856_v20  ;;  %1701 = vmatpush3.bf16.msra.mxu1 %v1910_v59 }
  0x94   : > { %596 = vmatprep.subr.bf16.mxu0 %v1857_v21  ;;  %1702 = vmatprep.subr.bf16.mxu1 %v1911_v60 }
  0x97   : > { %597 = vmatpush1.bf16.msra.mxu0 %v1859_v22  ;;  %1703 = vmatpush3.bf16.msra.mxu1 %v1912_v61 }
  0x98   : > { %598 = vmatprep.subr.bf16.mxu0 %v1860_v23  ;;  %1704 = vmatprep.subr.bf16.mxu1 %v1913_v63 }
  0x9b   : > { %599 = vmatpush1.bf16.msra.mxu0 %v1862_v24  ;;  %1705 = vmatpush3.bf16.msra.mxu1 %v1914_v0 }
  0x9c   : > { %600 = vmatprep.subr.bf16.mxu0 %v1863_v25 }
  0x9f   : > { %601 = vmatpush1.bf16.msra.mxu0 %v1865_v26 }
  0xa0   : > { %602 = vmatprep.subr.bf16.mxu0 %v1866_v27 }
  0xa3   : > { %603 = vmatpush1.bf16.msra.mxu0 %v1868_v28 }
  0xa4   : > { %604 = vmatprep.subr.bf16.mxu0 %v1869_v29 }
  0xa7   : > { %605 = vmatpush1.bf16.msra.mxu0 %v1871_v30 }
  0xa8   : > { %606 = vmatprep.subr.bf16.mxu0 %v1872_v31 }
  0xab   : > { %607 = vmatpush1.bf16.msra.mxu0 %v1874_v32 }
  0xae   : > { %609 = vmatmul.mubr.bf16.vlgmr.msra.gmra.mrb[0].mxu0 %v1875_v33 }
  0xaf   : > { %618 = vmatprep.mubr.bf16.mxu0 %v1878_v34 }
  0xb6   : > { %619 = vmatmul.mubr.bf16.gmra.mrb[4].mxu0 %v1880_v35 }
  0xb7   : > { %628 = vmatprep.mubr.bf16.mxu0 %v1881_v36 }
  0xbe   : > { %629 = vmatmul.mubr.bf16.gmra.mrb[8].mxu0 %v1883_v37 }
  0xbf   : > { %638 = vmatprep.mubr.bf16.mxu0 %v1884_v38 }
  0xc6   : > { %639 = vmatmul.mubr.bf16.gmra.mrb[12].mxu0 %v1886_v39 }
  0xc7   : > { %648 = vmatprep.mubr.bf16.mxu0 %v1887_v40 }
  0xce   : > { %649 = vmatmul.mubr.bf16.gmra.mrb[16].mxu0 %v1889_v41 }
  0xcf   : > { %658 = vmatprep.mubr.bf16.mxu0 %v1890_v42 }
  0xd6   : > { %659 = vmatmul.mubr.bf16.gmra.mrb[20].mxu0 %v1892_v43 }
  0xd7   : > { %668 = vmatprep.mubr.bf16.mxu0 %v1893_v44 }
  0xde   : > { %669 = vmatmul.mubr.bf16.gmra.mrb[24].mxu0 %v1895_v45 }
  0xdf   : > { %678 = vmatprep.mubr.bf16.mxu0 %v1896_v46 }
  0xe6   : > { %679 = vmatmul.mubr.bf16.gmra.mrb[28].mxu0 %v1898_v47 }
 0x181   : > { %v610_v7 = vpop.f32.mrb[0].mxu0 }
 0x182   : > { %v2523_v8 = vadd.f32 %v610_v7, %v2518_v5  ;;  %v612_v9 = vpop.f32.mrb[1].mxu0 }
 0x183   : > { %v2526_v10 = vadd.f32 %v612_v9, %v2520_v6  ;;  %v614_v11 = vpop.f32.mrb[2].mxu0 }
 0x184   : > { %v721_v12 = vand.u32 2147483647, %v2523_v8  ;;  %v2530_v13 = vadd.f32 %v614_v11, %v2518_v5  ;;  %v616_v14 = vpop.f32.mrb[3].mxu0  ;;  %v689_v61 = vmax.f32 %v2523_v8, 0.0 }
 0x185   : > { %v722_v15 = vand.u32 2147483647, %v2526_v10  ;;  %v2534_v16 = vadd.f32 %v616_v14, %v2520_v6  ;;  %v690_v0 = vmax.f32 %v2526_v10, 0.0 }
 0x186   : > { %v753_v17 = vsub.f32 0.0, %v721_v12  ;;  %v723_v18 = vand.u32 2147483647, %v2530_v13  ;;  %v691_v4 = vmax.f32 %v2530_v13, 0.0 }
 0x187   : > { %v754_v19 = vsub.f32 0.0, %v722_v15  ;;  %v724_v20 = vand.u32 2147483647, %v2534_v16 }
 0x188   : > { %v785_v21 = vmul.f32 1.442695, %v753_v17  ;;  %v755_v22 = vsub.f32 0.0, %v723_v18 }
 0x189   : > { %v787_v23 = vmul.f32 1.442695, %v754_v19  ;;  %v756_v24 = vsub.f32 0.0, %v724_v20  ;;  %v620_v25 = vpop.f32.mrb[4].mxu0 }
 0x18a   : > { %1915 = vpow2.f32 %v785_v21  ;;  %v789_v26 = vmul.f32 1.442695, %v755_v22  ;;  %v2539_v27 = vadd.f32 %v620_v25, %v2518_v5  ;;  %v622_v28 = vpop.f32.mrb[5].mxu0 }
 0x18b   : > { %1917 = vpow2.f32 %v787_v23  ;;  %v791_v29 = vmul.f32 1.442695, %v756_v24  ;;  %v2542_v30 = vadd.f32 %v622_v28, %v2520_v6  ;;  %v624_v31 = vpop.f32.mrb[6].mxu0 }
 0x18c   : > { %1919 = vpow2.f32 %v789_v26  ;;  %v725_v32 = vand.u32 2147483647, %v2539_v27  ;;  %v2546_v33 = vadd.f32 %v624_v31, %v2518_v5  ;;  %v626_v34 = vpop.f32.mrb[7].mxu0  ;;  %v693_v12 = vmax.f32 %v2539_v27, 0.0 }
 0x18d   : > { %1921 = vpow2.f32 %v791_v29  ;;  %v726_v35 = vand.u32 2147483647, %v2542_v30  ;;  %v2550_v36 = vadd.f32 %v626_v34, %v2520_v6  ;;  %v694_v14 = vmax.f32 %v2542_v30, 0.0 }
 0x18e   : > { %v757_v37 = vsub.f32 0.0, %v725_v32  ;;  %v727_v38 = vand.u32 2147483647, %v2546_v33  ;;  %v695_v15 = vmax.f32 %v2546_v33, 0.0 }
 0x18f   : > { %v758_v39 = vsub.f32 0.0, %v726_v35  ;;  %v728_v40 = vand.u32 2147483647, %v2550_v36 }
 0x190   : > { %v793_v41 = vmul.f32 1.442695, %v757_v37  ;;  %v759_v42 = vsub.f32 0.0, %v727_v38 }
 0x191   : > { %v795_v43 = vmul.f32 1.442695, %v758_v39  ;;  %v760_v44 = vsub.f32 0.0, %v728_v40  ;;  %v630_v45 = vpop.f32.mrb[8].mxu0 }
 0x192   : > { %1923 = vpow2.f32 %v793_v41  ;;  %v797_v46 = vmul.f32 1.442695, %v759_v42  ;;  %v2555_v47 = vadd.f32 %v630_v45, %v2518_v5  ;;  %v632_v48 = vpop.f32.mrb[9].mxu0 }
 0x193   : > { %1925 = vpow2.f32 %v795_v43  ;;  %v799_v49 = vmul.f32 1.442695, %v760_v44  ;;  %v2557_v50 = vpop.f32.mrb[10].mxu0  ;;  %v2594_v23 = vadd.f32 %v632_v48, %v2520_v6 }
 0x194   : > { %v2559_v51 = vpop.eup %1915  ;;  %1927 = vpow2.f32 %v797_v46  ;;  %v729_v52 = vand.u32 2147483647, %v2555_v47  ;;  %v2562_v53 = vpop.f32.mrb[11].mxu0 }
 0x195   : > { %v2564_v54 = vpop.eup %1917  ;;  %v849_v55 = vadd.f32 1.0, %v2559_v51  ;;  %1929 = vpow2.f32 %v799_v49  ;;  %v852_v62 = vmul.f32 -0.5, %v2559_v51  ;;  %v855_v63 = vand.u32 2147483647, %v2559_v51 }
 0x196   : > { %v2567_v56 = vpop.eup %1919  ;;  %v858_v57 = vadd.f32 1.0, %v2564_v54  ;;  %v761_v60 = vsub.f32 0.0, %v729_v52  ;;  %v861_v1 = vmul.f32 -0.5, %v2564_v54  ;;  %v864_v3 = vand.u32 2147483647, %v2564_v54 }
 0x197   : > { %v2570_v58 = vpop.eup %1921  ;;  %1931 = vlog2.f32 %v849_v55  ;;  %v867_v59 = vadd.f32 1.0, %v2567_v56  ;;  %v853_v20 = vadd.f32 1.0, %v852_v62  ;;  %v870_v21 = vmul.f32 -0.5, %v2567_v56 }
 0x198   : > { %1933 = vlog2.f32 %v858_v57  ;;  %v876_v9 = vadd.f32 1.0, %v2570_v58  ;;  %v801_v17 = vmul.f32 1.442695, %v761_v60  ;;  %vm2598_vm0 = vcmp.lt.f32.partialorder %v855_v63, 0.0004427343 }
 0x199   : > { %1935 = vlog2.f32 %v867_v59  ;;  %v2578_v2 = vpop.f32.mrb[12].mxu0  ;;  %v862_v28 = vadd.f32 1.0, %v861_v1  ;;  %vm2602_vm1 = vcmp.lt.f32.partialorder %v864_v3, 0.0004427343  ;;  %v873_v34 = vand.u32 2147483647, %v2567_v56 }
 0x19a   : > { %v2584_v11 = vpop.f32.mrb[13].mxu0  ;;  %1937 = vpow2.f32 %v801_v17  ;;  %v871_v41 = vadd.f32 1.0, %v870_v21  ;;  %v882_v42 = vand.u32 2147483647, %v2570_v58  ;;  %v730_v43 = vand.u32 2147483647, %v2594_v23 }
 0x19b   : > { %v2589_v18 = vpop.f32.mrb[14].mxu0  ;;  %1939 = vlog2.f32 %v876_v9  ;;  %v879_v57 = vmul.f32 -0.5, %v2570_v58  ;;  %v2617_v60 = vadd.f32 %v2557_v50, %v2518_v5  ;;  %v854_v17 = vmul.f32 %v2559_v51, %v853_v20 }
 0x19c   : > { %v1924_v19 = vpop.eup %1923  ;;  %v2596_v24 = vpop.f32.mrb[15].mxu0  ;;  %v863_v21 = vmul.f32 %v2564_v54, %v862_v28  ;;  %vm2626_vm2 = vcmp.lt.f32.partialorder %v873_v34, 0.0004427343  ;;  %v762_v22 = vsub.f32 0.0, %v730_v43  ;;  %vm2685_vm7 = vcmp.lt.f32.partialorder %v882_v42, 0.0004427343 }
 0x19d   : > { %v1926_v25 = vpop.eup %1925  ;;  %v885_v29 = vadd.f32 1.0, %v1924_v19  ;;  %v888_v38 = vmul.f32 -0.5, %v1924_v19  ;;  %v891_v45 = vand.u32 2147483647, %v1924_v19  ;;  %v880_v51 = vadd.f32 1.0, %v879_v57 }
 0x19e   : > { %v1928_v31 = vpop.eup %1927  ;;  %v894_v35 = vadd.f32 1.0, %v1926_v25  ;;  %v897_v39 = vmul.f32 -0.5, %v1926_v25  ;;  %v900_v59 = vand.u32 2147483647, %v1926_v25  ;;  %v2704_v20 = vadd.f32 %v2589_v18, %v2518_v5 }
 0x19f   : > { %v2607_v37 = vpop.eup %1929  ;;  %1941 = vlog2.f32 %v885_v29  ;;  %v903_v40 = vadd.f32 1.0, %v1928_v31  ;;  %v906_v46 = vmul.f32 -0.5, %v1928_v31  ;;  %v889_v3 = vadd.f32 1.0, %v888_v38 }
 0x1a0   : > { %1943 = vlog2.f32 %v894_v35  ;;  %v912_v48 = vadd.f32 1.0, %v2607_v37  ;;  %v898_v9 = vadd.f32 1.0, %v897_v39  ;;  %v909_v35 = vand.u32 2147483647, %v1928_v31 }
 0x1a1   : > { %v1932_v44 = vpop.eup %1931  ;;  %1945 = vlog2.f32 %v903_v40  ;;  %v2612_v49 = vpop.f32.mrb[16].mxu0  ;;  %v907_v7 = vadd.f32 1.0, %v906_v46  ;;  %vm2634_vm3 = vcmp.lt.f32.partialorder %v891_v45, 0.0004427343  ;;  %vm2638_vm4 = vcmp.lt.f32.partialorder %v900_v59, 0.0004427343 }
 0x1a2   : > { %v1934_v52 = vpop.eup %1933  ;;  %v851_v55 = vmul.f32 0.6931472, %v1932_v44  ;;  %v2619_v62 = vpop.f32.mrb[17].mxu0  ;;  %1947 = vlog2.f32 %v912_v48  ;;  %v872_v44 = vmul.f32 %v2567_v56, %v871_v41  ;;  %v890_v34 = vmul.f32 %v1924_v19, %v889_v3 }
 0x1a3   : > { %v1936_v63 = vpop.eup %1935  ;;  %v860_v1 = vmul.f32 0.6931472, %v1934_v52  ;;  %v2623_v40 = vpop.f32.mrb[18].mxu0  ;;  %v899_v39 = vmul.f32 %v1926_v25, %v898_v9  ;;  %v915_v41 = vmul.f32 -0.5, %v2607_v37  ;;  %vm2649_vm5 = vcmp.lt.f32.partialorder %v909_v35, 0.0004427343 }
 0x1a4   : > { %v869_v29 = vmul.f32 0.6931472, %v1936_v63  ;;  %v2630_v52 = vpop.f32.mrb[19].mxu0  ;;  %v857_v38 = vsel %vm2598_vm0, %v854_v17, %v851_v55  ;;  %v2642_v56 = vpop.eup %1937  ;;  %v803_v48 = vmul.f32 1.442695, %v762_v22  ;;  %v908_v57 = vmul.f32 %v1928_v31, %v907_v7 }
 0x1a5   : > { %v866_v28 = vsel %vm2602_vm1, %v863_v21, %v860_v1  ;;  %v1940_v26 = vpop.eup %1939  ;;  %v921_v46 = vadd.f32 1.0, %v2642_v56  ;;  %v1137_v32 = vadd.f32 %v857_v38, %v689_v61  ;;  %v918_v19 = vand.u32 2147483647, %v2607_v37 }
 0x1a6   : > { %v875_v43 = vsel %vm2626_vm2, %v872_v44, %v869_v29  ;;  %v731_v25 = vand.u32 2147483647, %v2617_v60  ;;  %v1138_v1 = vadd.f32 %v866_v28, %v690_v0  ;;  %v2664_v22 = vadd.f32 %v2562_v53, %v2520_v6 }
 0x1a7   : > { %1949 = vlog2.f32 %v921_v46  ;;  %v1139_v7 = vadd.f32 %v875_v43, %v691_v4  ;;  %v916_v17 = vadd.f32 1.0, %v915_v41  ;;  %v924_v44 = vmul.f32 -0.5, %v2642_v56 }
 0x1a8   : > { %v763_v21 = vsub.f32 0.0, %v731_v25  ;;  %1951 = vpow2.f32 %v803_v48  ;;  %v878_v38 = vmul.f32 0.6931472, %v1940_v26  ;;  %vm2679_vm6 = vcmp.lt.f32.partialorder %v918_v19, 0.0004427343 }
 0x1a9   : > { %v1942_v55 = vpop.eup %1941  ;;  %v2658_v59 = vpop.f32.mrb[20].mxu0  ;;  %1953 = vtanh.f32 %v1137_v32  ;;  %v732_v26 = vand.u32 2147483647, %v2664_v22  ;;  %v2698_v46 = vadd.f32 %v2584_v11, %v2520_v6  ;;  %v925_v48 = vadd.f32 1.0, %v924_v44 }
 0x1aa   : > { %v1944_v63 = vpop.eup %1943  ;;  %v887_v3 = vmul.f32 0.6931472, %v1942_v55  ;;  %v2666_v9 = vpop.f32.mrb[21].mxu0  ;;  %1955 = vtanh.f32 %v1138_v1  ;;  %v805_v41 = vmul.f32 1.442695, %v763_v21  ;;  %v881_v11 = vmul.f32 %v2570_v58, %v880_v51 }
 0x1ab   : > { %v1946_v61 = vpop.eup %1945  ;;  %v896_v31 = vmul.f32 0.6931472, %v1944_v63  ;;  %v2670_v29 = vpop.f32.mrb[22].mxu0  ;;  %1957 = vtanh.f32 %v1139_v7  ;;  %v764_v55 = vsub.f32 0.0, %v732_v26  ;;  %v927_v45 = vand.u32 2147483647, %v2642_v56 }
 0x1ac   : > { %v893_v0 = vsel %vm2634_vm3, %v890_v34, %v887_v3  ;;  %v905_v35 = vmul.f32 0.6931472, %v1946_v61  ;;  %v2675_v53 = vpop.f32.mrb[23].mxu0  ;;  %v1948_v50 = vpop.eup %1947  ;;  %v926_v58 = vmul.f32 %v2642_v56, %v925_v48  ;;  %v735_v51 = vand.u32 2147483647, %v2704_v20 }
 0x1ad   : > { %v1141_v4 = vadd.f32 %v893_v0, %v693_v12  ;;  %v902_v34 = vsel %vm2638_vm4, %v899_v39, %v896_v31  ;;  %v914_v43 = vmul.f32 0.6931472, %v1948_v50  ;;  %v2694_v12 = vadd.f32 %v2578_v2, %v2518_v5 }
 0x1ae   : > { %v911_v42 = vsel %vm2649_vm5, %v908_v57, %v905_v35  ;;  %v1142_v39 = vadd.f32 %v902_v34, %v694_v14  ;;  %v917_v2 = vmul.f32 %v2607_v37, %v916_v17  ;;  %v807_v57 = vmul.f32 1.442695, %v764_v55 }
 0x1af   : > { %1959 = vtanh.f32 %v1141_v4  ;;  %v733_v32 = vand.u32 2147483647, %v2694_v12  ;;  %v1143_v18 = vadd.f32 %v911_v42, %v695_v15  ;;  %v734_v37 = vand.u32 2147483647, %v2698_v46 }
 0x1b0   : > { %1961 = vpow2.f32 %v805_v41  ;;  %v920_v14 = vsel %vm2679_vm6, %v917_v2, %v914_v43  ;;  %v2727_v61 = vadd.f32 %v2596_v24, %v2520_v6  ;;  %v3338_v0 = vmax.f32 %v2550_v36, 0.0 }
 0x1b1   : > { %v2710_v19 = vpop.f32.mrb[24].mxu0  ;;  %v765_v63 = vsub.f32 0.0, %v733_v32  ;;  %v1950_v3 = vpop.eup %1949  ;;  %1963 = vpow2.f32 %v807_v57  ;;  %v766_v17 = vsub.f32 0.0, %v734_v37  ;;  %v767_v44 = vsub.f32 0.0, %v735_v51 }
 0x1b2   : > { %v2714_v25 = vpop.f32.mrb[25].mxu0  ;;  %1965 = vtanh.f32 %v1142_v39  ;;  %v923_v15 = vmul.f32 0.6931472, %v1950_v3  ;;  %v2731_v21 = vpop.eup %1951  ;;  %v1144_v35 = vadd.f32 %v920_v14, %v3338_v0  ;;  %v736_v56 = vand.u32 2147483647, %v2727_v61 }
 0x1b3   : > { %v2721_v1 = vpop.f32.mrb[26].mxu0  ;;  %v809_v31 = vmul.f32 1.442695, %v765_v63  ;;  %v2738_v50 = vadd.f32 %v2612_v49, %v2518_v5  ;;  %v1954_v24 = vpop.eup %1953  ;;  %v884_v4 = vsel %vm2685_vm7, %v881_v11, %v878_v38  ;;  %1967 = vtanh.f32 %v1143_v18 }
 0x1b4   : > { %v2729_v7 = vpop.f32.mrb[27].mxu0  ;;  %vm2742_vm8 = vcmp.lt.f32.partialorder %v927_v45, 0.0004427343  ;;  %v930_v34 = vadd.f32 1.0, %v2731_v21  ;;  %v2747_v41 = vpop.eup %1955  ;;  %v811_v43 = vmul.f32 1.442695, %v766_v17  ;;  %v2759_v32 = vadd.f32 %v2619_v62, %v2520_v6 }
 0x1b5   : > { %v929_v26 = vsel %vm2742_vm8, %v926_v58, %v923_v15  ;;  %1969 = vpow2.f32 %v809_v31  ;;  %v813_v49 = vmul.f32 1.442695, %v767_v44  ;;  %v1958_v42 = vpop.eup %1957  ;;  %v697_v48 = vmax.f32 %v2555_v47, 0.0 }
 0x1b6   : > { %1971 = vlog2.f32 %v930_v34  ;;  %v768_v38 = vsub.f32 0.0, %v736_v56  ;;  %v3341_v55 = vmax.f32 %v2534_v16, 0.0  ;;  %v737_v2 = vand.u32 2147483647, %v2738_v50 }
 0x1b7   : > { %1973 = vtanh.f32 %v1144_v35  ;;  %v1145_v57 = vadd.f32 %v929_v26, %v697_v48  ;;  %v738_v15 = vand.u32 2147483647, %v2759_v32  ;;  %v933_v44 = vmul.f32 -0.5, %v2731_v21 }
 0x1b8   : > { %v1140_v39 = vadd.f32 %v884_v4, %v3341_v55  ;;  %1975 = vpow2.f32 %v811_v43  ;;  %v815_v18 = vmul.f32 1.442695, %v768_v38  ;;  %v769_v37 = vsub.f32 0.0, %v737_v2 }
 0x1b9   : > { %v2752_v54 = vpop.f32.mrb[28].mxu0  ;;  %v1960_v45 = vpop.eup %1959  ;;  %1977 = vpow2.f32 %v813_v49  ;;  %v936_v56 = vand.u32 2147483647, %v2731_v21  ;;  %v770_v4 = vsub.f32 0.0, %v738_v15  ;;  %v2779_v34 = vmul.f32 %v1954_v24, %v2523_v8 }
 0x1ba   : > { %v2761_v11 = vpop.f32.mrb[29].mxu0  ;;  %v2765_v63 = vpop.eup %1961  ;;  %1979 = vpow2.f32 %v815_v18  ;;  %v817_v62 = vmul.f32 1.442695, %v769_v37  ;;  %v2788_v2 = vmul.f32 %v1958_v42, %v2530_v13  ;;  %v934_v37 = vadd.f32 1.0, %v933_v44 }
 0x1bb   : > { %v2763_v14 = vpop.f32.mrb[30].mxu0  ;;  %v939_v58 = vadd.f32 1.0, %v2765_v63  ;;  %v2770_v51 = vpop.eup %1963  ;;  %1981 = vtanh.f32 %v1140_v39  ;;  %v942_v48 = vmul.f32 -0.5, %v2765_v63  ;;  %v819_v55 = vmul.f32 1.442695, %v770_v4 }
 0x1bc   : > { %v2767_v3 = vpop.f32.mrb[31].mxu0  ;;  %v1966_v31 = vpop.eup %1965  ;;  %1983 = vtanh.f32 %v1145_v57  ;;  %v948_v35 = vadd.f32 1.0, %v2770_v51  ;;  %v2794_v57 = vadd.f32 %v2623_v40, %v2518_v5  ;;  %vm2796_vm9 = vcmp.lt.f32.partialorder %v936_v56, 0.0004427343 }
 0x1bd   : > { %1985 = vpow2.f32 %v817_v62  ;;  %v1968_v28 = vpop.eup %1967  ;;  %v2804_v13 = vmul.f32 %v1960_v45, %v2539_v27  ;;  %v945_v42 = vand.u32 2147483647, %v2765_v63  ;;  %v2812_v44 = vmul.f32 %v1966_v31, %v2542_v30 }
 0x1be   : > { %1987 = vlog2.f32 %v939_v58  ;;  %v943_v24 = vadd.f32 1.0, %v942_v48  ;;  %v954_v27 = vand.u32 2147483647, %v2770_v51  ;;  %v739_v38 = vand.u32 2147483647, %v2794_v57 }
 0x1bf   : > { %v2783_v49 = vpop.eup %1969  ;;  %1989 = vlog2.f32 %v948_v35  ;;  %3344 = vst [vmem:[#allocation12_spill] sm:$0xff] %v2804_v13  ;;  %v951_v35 = vmul.f32 -0.5, %v2770_v51  ;;  %3345 = vst [vmem:[#allocation13_spill] sm:$0xff] %v2812_v44  ;;  %v2823_v40 = vmul.f32 %v1968_v28, %v2546_v33  ;;  %v935_v30 = vmul.f32 %v2731_v21, %v934_v37 }
 0x1c0   : > { %v1972_v39 = vpop.eup %1971  ;;  %v957_v8 = vadd.f32 1.0, %v2783_v49  ;;  %1991 = vpow2.f32 %v819_v55  ;;  %v960_v31 = vmul.f32 -0.5, %v2783_v49  ;;  %vm2831_vm10 = vcmp.lt.f32.partialorder %v945_v42, 0.0004427343 }
 0x1c1   : > { %v1974_v18 = vpop.eup %1973  ;;  %v932_v56 = vmul.f32 0.6931472, %v1972_v39  ;;  %3346 = vst [vmem:[#allocation14_spill] sm:$0xff] %v2823_v40  ;;  %v952_v0 = vadd.f32 1.0, %v951_v35  ;;  %v2837_v17 = vadd.f32 %v2630_v52, %v2520_v6  ;;  %v944_v28 = vmul.f32 %v2765_v63, %v943_v24 }
 0x1c2   : > { %v2801_v15 = vpop.eup %1975  ;;  %1993 = vlog2.f32 %v957_v8  ;;  %v2829_v26 = vmul.f32 %v1974_v18, %v2550_v36  ;;  %vm2845_vm11 = vcmp.lt.f32.partialorder %v954_v27, 0.0004427343  ;;  %v771_v52 = vsub.f32 0.0, %v739_v38 }
 0x1c3   : > { %v2809_v4 = vpop.eup %1977  ;;  %v966_v55 = vadd.f32 1.0, %v2801_v15  ;;  %v938_v21 = vsel %vm2796_vm9, %v935_v30, %v932_v56  ;;  %v961_v48 = vadd.f32 1.0, %v960_v31  ;;  %v963_v40 = vand.u32 2147483647, %v2783_v49 }
 0x1c4   : > { %v2815_v62 = vpop.eup %1979  ;;  %v975_v45 = vadd.f32 1.0, %v2809_v4  ;;  %3347 = vst [vmem:[#allocation15_spill] sm:$0xff] %v2829_v26  ;;  %v969_v58 = vmul.f32 -0.5, %v2801_v15  ;;  %v3352_v24 = vmax.f32 %v2594_v23, 0.0  ;;  %v972_v27 = vand.u32 2147483647, %v2801_v15 }
 0x1c5   : > { %v2820_v43 = vpop.eup %1981  ;;  %1995 = vlog2.f32 %v966_v55  ;;  %v984_v36 = vadd.f32 1.0, %v2815_v62  ;;  %v953_v55 = vmul.f32 %v2770_v51, %v952_v0  ;;  %v978_v31 = vmul.f32 -0.5, %v2809_v4 }
 0x1c6   : > { %v1984_v39 = vpop.eup %1983  ;;  %1997 = vlog2.f32 %v975_v45  ;;  %v1146_v56 = vadd.f32 %v938_v21, %v3352_v24  ;;  %v987_v42 = vmul.f32 -0.5, %v2815_v62  ;;  %v981_v21 = vand.u32 2147483647, %v2809_v4 }
 0x1c7   : > { %v2839_v33 = vpop.eup %1985  ;;  %1999 = vlog2.f32 %v984_v36  ;;  %v2863_v13 = vmul.f32 %v1984_v39, %v2555_v47  ;;  %v821_v24 = vmul.f32 1.442695, %v771_v52  ;;  %v962_v51 = vmul.f32 %v2783_v49, %v961_v48 }
 0x1c8   : > { %v1988_v18 = vpop.eup %1987  ;;  %v993_v63 = vadd.f32 1.0, %v2839_v33  ;;  %vm2867_vm12 = vcmp.lt.f32.partialorder %v963_v40, 0.0004427343  ;;  %v970_v45 = vadd.f32 1.0, %v969_v58  ;;  %v740_v44 = vand.u32 2147483647, %v2837_v17 }
 0x1c9   : > { %v1990_v35 = vpop.eup %1989  ;;  %v941_v38 = vmul.f32 0.6931472, %v1988_v18  ;;  %3353 = vst [vmem:[#allocation16_spill] sm:$0xff] %v2863_v13  ;;  %v2875_v47 = vadd.f32 %v2658_v59, %v2518_v5  ;;  %vm2879_vm13 = vcmp.lt.f32.partialorder %v972_v27, 0.0004427343  ;;  %v979_v40 = vadd.f32 1.0, %v978_v31 }
 0x1ca   : > { %v2858_v30 = vpop.eup %1991  ;;  %v950_v26 = vmul.f32 0.6931472, %v1990_v35  ;;  %2001 = vlog2.f32 %v993_v63  ;;  %v988_v48 = vadd.f32 1.0, %v987_v42  ;;  %v990_v52 = vand.u32 2147483647, %v2815_v62 }
 0x1cb   : > { %2003 = vtanh.f32 %v1146_v56  ;;  %v1002_v36 = vadd.f32 1.0, %v2858_v30  ;;  %v947_v39 = vsel %vm2831_vm10, %v944_v28, %v941_v38  ;;  %vm2886_vm14 = vcmp.lt.f32.partialorder %v981_v21, 0.0004427343 }
 0x1cc   : > { %v1994_v18 = vpop.eup %1993  ;;  %v956_v35 = vsel %vm2845_vm11, %v953_v55, %v950_v26  ;;  %2005 = vpow2.f32 %v821_v24  ;;  %v772_v59 = vsub.f32 0.0, %v740_v44  ;;  %v2892_v8 = vadd.f32 %v2666_v9, %v2520_v6 }
 0x1cd   : > { %v959_v63 = vmul.f32 0.6931472, %v1994_v18  ;;  %v971_v56 = vmul.f32 %v2801_v15, %v970_v45  ;;  %v996_v42 = vmul.f32 -0.5, %v2839_v33  ;;  %v741_v27 = vand.u32 2147483647, %v2875_v47 }
 0x1ce   : > { %v3360_v26 = vmax.f32 %v2617_v60, 0.0  ;;  %v999_v38 = vand.u32 2147483647, %v2839_v33  ;;  %2007 = vlog2.f32 %v1002_v36  ;;  %v823_v44 = vmul.f32 1.442695, %v772_v59 }
 0x1cf   : > { %v1996_v28 = vpop.eup %1995  ;;  %v3361_v31 = vmax.f32 %v2664_v22, 0.0  ;;  %v980_v21 = vmul.f32 %v2809_v4, %v979_v40  ;;  %v989_v24 = vmul.f32 %v2815_v62, %v988_v48  ;;  %v773_v15 = vsub.f32 0.0, %v741_v27 }
 0x1d0   : > { %v1998_v37 = vpop.eup %1997  ;;  %v1147_v55 = vadd.f32 %v947_v39, %v3360_v26  ;;  %v968_v45 = vmul.f32 0.6931472, %v1996_v28  ;;  %2009 = vpow2.f32 %v823_v44  ;;  %v742_v18 = vand.u32 2147483647, %v2892_v8 }
 0x1d1   : > { %v1148_v9 = vadd.f32 %v956_v35, %v3361_v31  ;;  %v2907_v13 = vadd.f32 %v2670_v29, %v2518_v5  ;;  %v2000_v39 = vpop.eup %1999  ;;  %v965_v36 = vsel %vm2867_vm12, %v962_v51, %v959_v63  ;;  %v977_v59 = vmul.f32 0.6931472, %v1998_v37 }
 0x1d2   : > { %vm2911_vm15 = vcmp.lt.f32.partialorder %v990_v52, 0.0004427343  ;;  %v825_v4 = vmul.f32 1.442695, %v773_v15  ;;  %2011 = vtanh.f32 %v1147_v55  ;;  %v997_v62 = vadd.f32 1.0, %v996_v42 }
 0x1d3   : > { %vm2915_vm0 = vcmp.lt.f32.partialorder %v999_v38, 0.0004427343  ;;  %v774_v48 = vsub.f32 0.0, %v742_v18  ;;  %2013 = vtanh.f32 %v1148_v9  ;;  %v1005_v29 = vmul.f32 -0.5, %v2858_v30 }
 0x1d4   : > { %v2002_v28 = vpop.eup %2001  ;;  %v743_v0 = vand.u32 2147483647, %v2907_v13  ;;  %v2923_v51 = vadd.f32 %v2675_v53, %v2520_v6  ;;  %v3366_v63 = vmax.f32 %v2694_v12, 0.0  ;;  %v974_v42 = vsel %vm2879_vm13, %v971_v56, %v968_v45 }
 0x1d5   : > { %v2004_v52 = vpop.eup %2003  ;;  %v986_v37 = vmul.f32 0.6931472, %v2000_v39  ;;  %v827_v26 = vmul.f32 1.442695, %v774_v48  ;;  %v983_v55 = vsel %vm2886_vm14, %v980_v21, %v977_v59  ;;  %v1008_v38 = vand.u32 2147483647, %v2858_v30 }
 0x1d6   : > { %v1149_v27 = vadd.f32 %v965_v36, %v3366_v63  ;;  %2015 = vpow2.f32 %v825_v4  ;;  %v775_v44 = vsub.f32 0.0, %v743_v0  ;;  %v2932_v31 = vpop.eup %2005  ;;  %v995_v53 = vmul.f32 0.6931472, %v2002_v28 }
 0x1d7   : > { %2017 = vpow2.f32 %v827_v26  ;;  %v744_v9 = vand.u32 2147483647, %v2923_v51  ;;  %v2937_v15 = vadd.f32 %v2710_v19, %v2518_v5  ;;  %v3367_v49 = vmax.f32 %v2698_v46, 0.0 }
 0x1d8   : > { %v998_v58 = vmul.f32 %v2839_v33, %v997_v62  ;;  %v1006_v21 = vadd.f32 1.0, %v1005_v29  ;;  %v1011_v45 = vadd.f32 1.0, %v2932_v31  ;;  %v2008_v18 = vpop.eup %2007  ;;  %2019 = vtanh.f32 %v1149_v27 }
 0x1d9   : > { %v1150_v56 = vadd.f32 %v974_v42, %v3367_v49  ;;  %v992_v39 = vsel %vm2911_vm15, %v989_v24, %v986_v37  ;;  %v829_v36 = vmul.f32 1.442695, %v775_v44  ;;  %v776_v59 = vsub.f32 0.0, %v744_v9 }
 0x1da   : > { %v2946_v4 = vmul.f32 %v2004_v52, %v2594_v23  ;;  %v3368_v19 = vmax.f32 %v2704_v20, 0.0  ;;  %vm2950_vm1 = vcmp.lt.f32.partialorder %v1008_v38, 0.0004427343  ;;  %2021 = vlog2.f32 %v1011_v45  ;;  %v2954_v33 = vpop.eup %2009 }
 0x1db   : > { %v1001_v62 = vsel %vm2915_vm0, %v998_v58, %v995_v53  ;;  %2023 = vpow2.f32 %v829_v36  ;;  %v831_v24 = vmul.f32 1.442695, %v776_v59  ;;  %v745_v35 = vand.u32 2147483647, %v2937_v15 }
 0x1dc   : > { %v1151_v48 = vadd.f32 %v983_v55, %v3368_v19  ;;  %2025 = vtanh.f32 %v1150_v56  ;;  %v3371_v23 = vmax.f32 %v2727_v61, 0.0  ;;  %v1004_v0 = vmul.f32 0.6931472, %v2008_v18  ;;  %v2012_v63 = vpop.eup %2011 }
 0x1dd   : > { %v1020_v52 = vadd.f32 1.0, %v2954_v33  ;;  %v1007_v27 = vmul.f32 %v2858_v30, %v1006_v21  ;;  %v709_v42 = vmax.f32 %v2875_v47, 0.0  ;;  %2027 = vpow2.f32 %v831_v24  ;;  %v2014_v40 = vpop.eup %2013 }
 0x1de   : > { %v1152_v29 = vadd.f32 %v992_v39, %v3371_v23  ;;  %v777_v37 = vsub.f32 0.0, %v745_v35  ;;  %v3372_v26 = vmax.f32 %v2738_v50, 0.0  ;;  %v1014_v38 = vmul.f32 -0.5, %v2932_v31 }
 0x1df   : > { %2029 = vlog2.f32 %v1020_v52  ;;  %v2969_v44 = vadd.f32 %v2714_v25, %v2520_v6  ;;  %v710_v53 = vmax.f32 %v2892_v8, 0.0  ;;  %v1010_v56 = vsel %vm2950_vm1, %v1007_v27, %v1004_v0 }
 0x1e0   : > { %v1153_v55 = vadd.f32 %v1001_v62, %v3372_v26  ;;  %2031 = vtanh.f32 %v1151_v48  ;;  %v833_v9 = vmul.f32 1.442695, %v777_v37  ;;  %v2016_v49 = vpop.eup %2015  ;;  %v1017_v58 = vand.u32 2147483647, %v2932_v31 }
 0x1e1   : > { %2033 = vtanh.f32 %v1152_v29  ;;  %v746_v21 = vand.u32 2147483647, %v2969_v44  ;;  %v2018_v45 = vpop.eup %2017  ;;  %v1023_v18 = vmul.f32 -0.5, %v2954_v33  ;;  %v1029_v25 = vadd.f32 1.0, %v2016_v49 }
 0x1e2   : > { %2035 = vpow2.f32 %v833_v9  ;;  %v2980_v39 = vadd.f32 %v2721_v1, %v2518_v5  ;;  %v1015_v36 = vadd.f32 1.0, %v1014_v38  ;;  %v1038_v59 = vadd.f32 1.0, %v2018_v45  ;;  %v2982_v48 = vpop.eup %2019 }
 0x1e3   : > { %2037 = vtanh.f32 %v1153_v55  ;;  %v778_v19 = vsub.f32 0.0, %v746_v21  ;;  %v2985_v28 = vmul.f32 %v2012_v63, %v2617_v60  ;;  %v2988_v62 = vmul.f32 %v2014_v40, %v2664_v22 }
 0x1e4   : > { %v3373_v24 = vmax.f32 %v2759_v32, 0.0  ;;  %2039 = vlog2.f32 %v1029_v25  ;;  %v2022_v23 = vpop.eup %2021  ;;  %vm2992_vm2 = vcmp.lt.f32.partialorder %v1017_v58, 0.0004427343  ;;  %v1032_v29 = vmul.f32 -0.5, %v2016_v49 }
 0x1e5   : > { %2041 = vlog2.f32 %v1038_v59  ;;  %v835_v0 = vmul.f32 1.442695, %v778_v19  ;;  %v2996_v52 = vpop.eup %2023  ;;  %v1013_v27 = vmul.f32 0.6931472, %v2022_v23  ;;  %v1024_v60 = vadd.f32 1.0, %v1023_v18 }
 0x1e6   : > { %v1154_v35 = vadd.f32 %v1010_v56, %v3373_v24  ;;  %v1041_v63 = vmul.f32 -0.5, %v2018_v45  ;;  %v747_v22 = vand.u32 2147483647, %v2980_v39  ;;  %v2999_v37 = vpop.eup %2025  ;;  %v1016_v40 = vmul.f32 %v2932_v31, %v1015_v36 }
 0x1e7   : > { %v1026_v26 = vand.u32 2147483647, %v2954_v33  ;;  %v1047_v55 = vadd.f32 1.0, %v2996_v52  ;;  %v3006_v38 = vadd.f32 %v2729_v7, %v2520_v6  ;;  %v3008_v9 = vpop.eup %2027  ;;  %v1035_v56 = vand.u32 2147483647, %v2016_v49 }
 0x1e8   : > { %v1044_v58 = vand.u32 2147483647, %v2018_v45  ;;  %2043 = vpow2.f32 %v835_v0  ;;  %v779_v21 = vsub.f32 0.0, %v747_v22  ;;  %v1019_v25 = vsel %vm2992_vm2, %v1016_v40, %v1013_v27 }
 0x1e9   : > { %v2030_v18 = vpop.eup %2029  ;;  %v1033_v59 = vadd.f32 1.0, %v1032_v29  ;;  %2045 = vlog2.f32 %v1047_v55  ;;  %v1050_v31 = vmul.f32 -0.5, %v2996_v52  ;;  %v1025_v7 = vmul.f32 %v2954_v33, %v1024_v60 }
 0x1ea   : > { %v3013_v36 = vpop.eup %2031  ;;  %v1022_v19 = vmul.f32 0.6931472, %v2030_v18  ;;  %v1042_v24 = vadd.f32 1.0, %v1041_v63  ;;  %v1056_v23 = vadd.f32 1.0, %v3008_v9  ;;  %2047 = vtanh.f32 %v1154_v35 }
 0x1eb   : > { %v3017_v30 = vpop.eup %2033  ;;  %vm3019_vm3 = vcmp.lt.f32.partialorder %v1026_v26, 0.0004427343  ;;  %v837_v29 = vmul.f32 1.442695, %v779_v21  ;;  %v3378_v22 = vmax.f32 %v2794_v57, 0.0  ;;  %v1034_v63 = vmul.f32 %v2016_v49, %v1033_v59 }
 0x1ec   : > { %v3024_v27 = vpop.eup %2035  ;;  %v1028_v33 = vsel %vm3019_vm3, %v1025_v7, %v1022_v19  ;;  %vm3030_vm4 = vcmp.lt.f32.partialorder %v1035_v56, 0.0004427343  ;;  %2049 = vlog2.f32 %v1056_v23  ;;  %vm3036_vm5 = vcmp.lt.f32.partialorder %v1044_v58, 0.0004427343 }
 0x1ed   : > { %v1155_v40 = vadd.f32 %v1019_v25, %v3378_v22  ;;  %v3034_v35 = vpop.eup %2037  ;;  %v1051_v55 = vadd.f32 1.0, %v1050_v31  ;;  %v1065_v21 = vadd.f32 1.0, %v3024_v27  ;;  %v1043_v25 = vmul.f32 %v2018_v45, %v1042_v24 }
 0x1ee   : > { %v2040_v18 = vpop.eup %2039  ;;  %2051 = vpow2.f32 %v837_v29  ;;  %v748_v19 = vand.u32 2147483647, %v3006_v38  ;;  %v3044_v56 = vadd.f32 %v2752_v54, %v2518_v5  ;;  %v3383_v23 = vmax.f32 %v2837_v17, 0.0 }
 0x1ef   : > { %v2042_v7 = vpop.eup %2041  ;;  %v1031_v58 = vmul.f32 0.6931472, %v2040_v18  ;;  %v1053_v59 = vand.u32 2147483647, %v2996_v52  ;;  %v1059_v31 = vmul.f32 -0.5, %v3008_v9  ;;  %2053 = vtanh.f32 %v1155_v40 }
 0x1f0   : > { %v1156_v49 = vadd.f32 %v1028_v33, %v3383_v23  ;;  %v1040_v0 = vmul.f32 0.6931472, %v2042_v7  ;;  %v1062_v45 = vand.u32 2147483647, %v3008_v9  ;;  %v780_v24 = vsub.f32 0.0, %v748_v19 }
 0x1f1   : > { %v1037_v29 = vsel %vm3030_vm4, %v1034_v63, %v1031_v58  ;;  %v1052_v54 = vmul.f32 %v2996_v52, %v1051_v55  ;;  %2055 = vlog2.f32 %v1065_v21  ;;  %v749_v22 = vand.u32 2147483647, %v3044_v56 }
 0x1f2   : > { %v3055_v1 = vpop.eup %2043  ;;  %v1157_v33 = vadd.f32 %v1037_v29, %v709_v42  ;;  %v1046_v40 = vsel %vm3036_vm5, %v1043_v25, %v1040_v0  ;;  %v1202_v18 = vmul.f32 %v2747_v41, %v2526_v10  ;;  %v1204_v60 = vmul.f32 %v2820_v43, %v2534_v16 }
 0x1f3   : > { %v2046_v63 = vpop.eup %2045  ;;  %2057 = vtanh.f32 %v1156_v49  ;;  %v1158_v52 = vadd.f32 %v1046_v40, %v710_v53  ;;  %v1060_v55 = vadd.f32 1.0, %v1059_v31  ;;  %v839_v21 = vmul.f32 1.442695, %v780_v24 }
 0x1f4   : > { %v1049_v19 = vmul.f32 0.6931472, %v2046_v63  ;;  %v1074_v7 = vadd.f32 1.0, %v3055_v1  ;;  %v781_v42 = vsub.f32 0.0, %v749_v22  ;;  %v1234_v23 = vpack.c.bf16 %v1204_v60, %v1202_v18  ;;  %v3068_v26 = vpop.eup %2047 }
 0x1f5   : > { %2059 = vtanh.f32 %v1157_v33  ;;  %vm1054_vm6 = vcmp.lt.f32.partialorder %v1053_v59, 0.0004427343  ;;  %v713_v10 = vmax.f32 %v2937_v15, 0.0  ;;  %v3073_v16 = vadd.f32 %v2761_v11, %v2520_v6 }
 0x1f6   : > { %v2050_v41 = vpop.eup %2049  ;;  %2061 = vtanh.f32 %v1158_v52  ;;  %v1055_v43 = vsel %vm1054_vm6, %v1052_v54, %v1049_v19  ;;  %vm3075_vm7 = vcmp.lt.f32.partialorder %v1062_v45, 0.0004427343  ;;  %v841_v25 = vmul.f32 1.442695, %v781_v42  ;;  %1416 = vmatprep.mubr.bf16.mxu1 %v1234_v23  ;;  %v3388_v19 = vld [vmem:[#allocation13_spill] sm:$0xff]  ;;  %v3391_v42 = vld [vmem:[#allocation14_spill] sm:$0xff] }
 0x1f7   : > { %v3386_v49 = vmax.f32 %v2907_v13, 0.0  ;;  %v1058_v31 = vmul.f32 0.6931472, %v2050_v41  ;;  %v1061_v59 = vmul.f32 %v3008_v9, %v1060_v55  ;;  %2063 = vpow2.f32 %v839_v21 }
 0x1f8   : > { %v3082_v0 = vpop.eup %2051  ;;  %v1068_v11 = vmul.f32 -0.5, %v3024_v27  ;;  %2065 = vlog2.f32 %v1074_v7  ;;  %v750_v24 = vand.u32 2147483647, %v3073_v16  ;;  %v1233_v45 = vpack.c.bf16 %v2788_v2, %v2779_v34  ;;  %v3389_v7 = vld [vmem:[#allocation15_spill] sm:$0xff] }
 0x1f9   : > { %v1159_v58 = vadd.f32 %v1055_v43, %v3386_v49  ;;  %v3090_v29 = vmul.f32 %v2982_v48, %v2694_v12  ;;  %v1064_v54 = vsel %vm3075_vm7, %v1061_v59, %v1058_v31  ;;  %v1083_v9 = vadd.f32 1.0, %v3082_v0  ;;  %v2054_v22 = vpop.eup %2053 }
 0x1fa   : > { %v3097_v33 = vmul.f32 %v2999_v37, %v2698_v46  ;;  %v3387_v40 = vmax.f32 %v2923_v51, 0.0  ;;  %v782_v34 = vsub.f32 0.0, %v750_v24  ;;  %1417 = vmatmul.mubr.bf16.vlgmr.msra.gmra.mrb[0].mxu1 %v1233_v45  ;;  %v3103_v12 = vmul.f32 %v3013_v36, %v2704_v20 }
 0x1fb   : > { %2067 = vtanh.f32 %v1159_v58  ;;  %v2056_v2 = vpop.eup %2055  ;;  %v3107_v48 = vmul.f32 %v3017_v30, %v2727_v61  ;;  %v3111_v46 = vadd.f32 %v2763_v14, %v2518_v5  ;;  %v1069_v37 = vadd.f32 1.0, %v1068_v11  ;;  %v3394_v11 = vld [vmem:[#allocation16_spill] sm:$0xff] }
 0x1fc   : > { %v1160_v18 = vadd.f32 %v1064_v54, %v3387_v40  ;;  %2069 = vpow2.f32 %v841_v25  ;;  %v843_v60 = vmul.f32 1.442695, %v782_v34  ;;  %v3115_v63 = vadd.f32 %v2767_v3, %v2520_v6 }
 0x1fd   : > { %2071 = vlog2.f32 %v1083_v9  ;;  %v2058_v52 = vpop.eup %2057  ;;  %v3119_v20 = vmul.f32 %v3034_v35, %v2738_v50  ;;  %v1071_v61 = vand.u32 2147483647, %v3024_v27  ;;  %v1086_v30 = vmul.f32 -0.5, %v3082_v0  ;;  %v3390_v35 = vld [vmem:[#allocation12_spill] sm:$0xff] }
 0x1fe   : > { %2073 = vtanh.f32 %v1160_v18  ;;  %v751_v36 = vand.u32 2147483647, %v3111_v46  ;;  %v1067_v5 = vmul.f32 0.6931472, %v2056_v2  ;;  %v715_v14 = vmax.f32 %v2980_v39, 0.0 }
 0x1ff   : > { %2075 = vpow2.f32 %v843_v60  ;;  %v752_v55 = vand.u32 2147483647, %v3115_v63  ;;  %v2060_v21 = vpop.eup %2059  ;;  %v1077_v6 = vmul.f32 -0.5, %v3055_v1  ;;  %v1236_v50 = vpack.c.bf16 %v3389_v7, %v3388_v19 }
 0x200   : > { %v783_v3 = vsub.f32 0.0, %v751_v36  ;;  %v1235_v23 = vpack.c.bf16 %v3391_v42, %v3390_v35  ;;  %v2062_v41 = vpop.eup %2061  ;;  %v1070_v43 = vmul.f32 %v3024_v27, %v1069_v37  ;;  %v1089_v53 = vand.u32 2147483647, %v3082_v0 }
 0x201   : > { %v784_v25 = vsub.f32 0.0, %v752_v55  ;;  %v1238_v49 = vpack.c.bf16 %v2988_v62, %v2946_v4  ;;  %v2064_v58 = vpop.eup %2063  ;;  %vm3135_vm8 = vcmp.lt.f32.partialorder %v1071_v61, 0.0004427343  ;;  %v1087_v59 = vadd.f32 1.0, %v1086_v30  ;;  %1424 = vmatprep.mubr.bf16.mxu1 %v1236_v50 }
 0x202   : > { %v1237_v24 = vpack.c.bf16 %v2985_v28, %v3394_v11  ;;  %v1240_v45 = vpack.c.bf16 %v3107_v48, %v3097_v33  ;;  %v2066_v27 = vpop.eup %2065  ;;  %v3145_v54 = vmul.f32 %v3068_v26, %v2759_v32  ;;  %v1073_v4 = vsel %vm3135_vm8, %v1070_v43, %v1067_v5  ;;  %1425 = vmatmul.mubr.bf16.gmra.mrb[4].mxu1 %v1235_v23 }
 0x203   : > { %v1080_v62 = vand.u32 2147483647, %v3055_v1  ;;  %v1092_v9 = vadd.f32 1.0, %v2064_v58  ;;  %v3151_v18 = vmul.f32 %v2054_v22, %v2794_v57  ;;  %v1220_v28 = vmul.f32 %v2058_v52, %v2837_v17  ;;  %1432 = vmatprep.mubr.bf16.mxu1 %v1238_v49 }
 0x204   : > { %v1078_v34 = vadd.f32 1.0, %v1077_v6  ;;  %v845_v33 = vmul.f32 1.442695, %v783_v3  ;;  %vm3159_vm9 = vcmp.lt.f32.partialorder %v1089_v53, 0.0004427343  ;;  %v3164_v57 = vmul.f32 %v2060_v21, %v2875_v47 }
 0x205   : > { %v2068_v40 = vpop.eup %2067  ;;  %2077 = vlog2.f32 %v1092_v9  ;;  %v847_v48 = vmul.f32 1.442695, %v784_v25  ;;  %v3167_v17 = vmul.f32 %v2062_v41, %v2892_v8  ;;  %v1161_v22 = vadd.f32 %v1073_v4, %v713_v10 }
 0x206   : > { %v3154_v2 = vpop.eup %2069  ;;  %v3157_v32 = vmul.f32 %v2068_v40, %v2907_v13  ;;  %v1088_v60 = vmul.f32 %v3082_v0, %v1087_v59  ;;  %v1076_v52 = vmul.f32 0.6931472, %v2066_v27  ;;  %v1095_v30 = vmul.f32 -0.5, %v2064_v58 }
 0x207   : > { %v2072_v37 = vpop.eup %2071  ;;  %v1239_v36 = vpack.c.bf16 %v3103_v12, %v3090_v29  ;;  %v1101_v47 = vadd.f32 1.0, %v3154_v2  ;;  %2079 = vpow2.f32 %v845_v33  ;;  %v1242_v8 = vpack.c.bf16 %v1220_v28, %v3145_v54 }
 0x208   : > { %v2074_v13 = vpop.eup %2073  ;;  %v1085_v61 = vmul.f32 0.6931472, %v2072_v37  ;;  %2081 = vpow2.f32 %v847_v48  ;;  %v1241_v0 = vpack.c.bf16 %v3151_v18, %v3119_v20  ;;  %v1243_v21 = vpack.c.bf16 %v3157_v32, %v3164_v57 }
 0x209   : > { %v1224_v5 = vmul.f32 %v2074_v13, %v2923_v51  ;;  %v3177_v55 = vpop.eup %2075  ;;  %2083 = vtanh.f32 %v1161_v22  ;;  %v1079_v51 = vmul.f32 %v3055_v1, %v1078_v34  ;;  %vm1081_vm10 = vcmp.lt.f32.partialorder %v1080_v62, 0.0004427343 }
 0x20a   : > { %v1091_v10 = vsel %vm3159_vm9, %v1088_v60, %v1085_v61  ;;  %v1110_v12 = vadd.f32 1.0, %v3177_v55  ;;  %1433 = vmatmul.mubr.bf16.gmra.mrb[8].mxu1 %v1237_v24  ;;  %v1096_v19 = vadd.f32 1.0, %v1095_v30  ;;  %v714_v7 = vmax.f32 %v2969_v44, 0.0 }
 0x20b   : > { %v1163_v29 = vadd.f32 %v1091_v10, %v715_v14  ;;  %v1244_v6 = vpack.c.bf16 %v1224_v5, %v3167_v17  ;;  %v1082_v3 = vsel %vm1081_vm10, %v1079_v51, %v1076_v52  ;;  %1440 = vmatprep.mubr.bf16.mxu1 %v1240_v45  ;;  %v1098_v20 = vand.u32 2147483647, %v2064_v58 }
 0x20c   : > { %v1162_v35 = vadd.f32 %v1082_v3, %v714_v7  ;;  %v1097_v1 = vmul.f32 %v2064_v58, %v1096_v19  ;;  %v716_v14 = vmax.f32 %v3006_v38, 0.0  ;;  %v1104_v31 = vmul.f32 -0.5, %v3154_v2 }
 0x20d   : > { %2085 = vtanh.f32 %v1163_v29  ;;  %vm1099_vm11 = vcmp.lt.f32.partialorder %v1098_v20, 0.0004427343  ;;  %v1113_v11 = vmul.f32 -0.5, %v3177_v55  ;;  %v1107_v62 = vand.u32 2147483647, %v3154_v2 }
 0x20e   : > { %2087 = vlog2.f32 %v1101_v47  ;;  %v1105_v4 = vadd.f32 1.0, %v1104_v31  ;;  %v1116_v28 = vand.u32 2147483647, %v3177_v55  ;;  %v717_v60 = vmax.f32 %v3044_v56, 0.0 }
 0x20f   : > { %2089 = vlog2.f32 %v1110_v12  ;;  %v2078_v50 = vpop.eup %2077  ;;  %v1114_v9 = vadd.f32 1.0, %v1113_v11  ;;  %vm1108_vm12 = vcmp.lt.f32.partialorder %v1107_v62, 0.0004427343  ;;  %v719_v12 = vmax.f32 %v3111_v46, 0.0 }
 0x210   : > { %v1094_v42 = vmul.f32 0.6931472, %v2078_v50  ;;  %2091 = vtanh.f32 %v1162_v35  ;;  %v1106_v48 = vmul.f32 %v3154_v2, %v1105_v4  ;;  %vm1117_vm13 = vcmp.lt.f32.partialorder %v1116_v28, 0.0004427343 }
 0x211   : > { %v2080_v23 = vpop.eup %2079  ;;  %v718_v2 = vmax.f32 %v3073_v16, 0.0 }
 0x212   : > { %v1100_v41 = vsel %vm1099_vm11, %v1097_v1, %v1094_v42  ;;  %v2082_v43 = vpop.eup %2081  ;;  %v1119_v25 = vadd.f32 1.0, %v2080_v23  ;;  %1441 = vmatmul.mubr.bf16.gmra.mrb[12].mxu1 %v1239_v36  ;;  %v1122_v34 = vmul.f32 -0.5, %v2080_v23  ;;  %v1125_v52 = vand.u32 2147483647, %v2080_v23 }
 0x213   : > { %v1164_v53 = vadd.f32 %v1100_v41, %v716_v14  ;;  %v2084_v49 = vpop.eup %2083  ;;  %v1128_v59 = vadd.f32 1.0, %v2082_v43  ;;  %1448 = vmatprep.mubr.bf16.mxu1 %v1242_v8  ;;  %v1131_v26 = vmul.f32 -0.5, %v2082_v43  ;;  %v1134_v5 = vand.u32 2147483647, %v2082_v43 }
 0x214   : > { %v1225_v45 = vmul.f32 %v2084_v49, %v2937_v15  ;;  %v1123_v17 = vadd.f32 1.0, %v1122_v34  ;;  %vm1126_vm14 = vcmp.lt.f32.partialorder %v1125_v52, 0.0004427343 }
 0x215   : > { %2093 = vtanh.f32 %v1164_v53  ;;  %v1132_v61 = vadd.f32 1.0, %v1131_v26  ;;  %vm1135_vm15 = vcmp.lt.f32.partialorder %v1134_v5, 0.0004427343  ;;  %v3214_v53 = vld [vmem:[%s3307_s4] ss:$0 sm:$0xff] }
 0x216   : > { %2095 = vlog2.f32 %v1119_v25  ;;  %v1124_v51 = vmul.f32 %v2080_v23, %v1123_v17 }
 0x217   : > { %v2086_v24 = vpop.eup %2085  ;;  %2097 = vlog2.f32 %v1128_v59  ;;  %v1133_v3 = vmul.f32 %v2082_v43, %v1132_v61 }
 0x218   : > { %v2088_v58 = vpop.eup %2087  ;;  %v1227_v27 = vmul.f32 %v2086_v24, %v2980_v39  ;;  %v1115_v39 = vmul.f32 %v3177_v55, %v1114_v9 }
 0x219   : > { %v2090_v54 = vpop.eup %2089  ;;  %v1103_v18 = vmul.f32 0.6931472, %v2088_v58 }
 0x21a   : > { %v1245_v40 = vpack.c.bf16 %v1227_v27, %v1225_v45  ;;  %v1112_v33 = vmul.f32 0.6931472, %v2090_v54  ;;  %1449 = vmatmul.mubr.bf16.gmra.mrb[16].mxu1 %v1241_v0  ;;  %v2092_v15 = vpop.eup %2091 }
 0x21b   : > { %1456 = vmatprep.mubr.bf16.mxu1 %v1244_v6  ;;  %v1109_v37 = vsel %vm1108_vm12, %v1106_v48, %v1103_v18  ;;  %v1226_v30 = vmul.f32 %v2092_v15, %v2969_v44 }
 0x21c   : > { %v1118_v13 = vsel %vm1117_vm13, %v1115_v39, %v1112_v33  ;;  %v1165_v8 = vadd.f32 %v1109_v37, %v717_v60 }
 0x21d   : > { %v1166_v55 = vadd.f32 %v1118_v13, %v718_v2 }
 0x21e   : > { %2099 = vtanh.f32 %v1165_v8 }
 0x21f   : > { %v2094_v22 = vpop.eup %2093  ;;  %2101 = vtanh.f32 %v1166_v55 }
 0x220   : > { %v1228_v36 = vmul.f32 %v2094_v22, %v3006_v38  ;;  %v2096_v47 = vpop.eup %2095  ;;  %v720_v38 = vmax.f32 %v3115_v63, 0.0 }
 0x221   : > { %v2098_v10 = vpop.eup %2097  ;;  %v1121_v0 = vmul.f32 0.6931472, %v2096_v47 }
 0x222   : > { %v1246_v29 = vpack.c.bf16 %v1228_v36, %v1226_v30  ;;  %v1130_v6 = vmul.f32 0.6931472, %v2098_v10  ;;  %1457 = vmatmul.mubr.bf16.gmra.mrb[20].mxu1 %v1243_v21 }
 0x223   : > { %v1127_v44 = vsel %vm1126_vm14, %v1124_v51, %v1121_v0 }
 0x224   : > { %1464 = vmatprep.mubr.bf16.mxu1 %v1246_v29  ;;  %v1167_v19 = vadd.f32 %v1127_v44, %v719_v12  ;;  %v1136_v7 = vsel %vm1135_vm15, %v1133_v3, %v1130_v6 }
 0x225   : > { %v1168_v20 = vadd.f32 %v1136_v7, %v720_v38 }
 0x226   : > { %2103 = vtanh.f32 %v1167_v19 }
 0x227   : > { %2105 = vtanh.f32 %v1168_v20 }
 0x228   : > { %v2100_v50 = vpop.eup %2099 }
 0x229   : > { %v2102_v35 = vpop.eup %2101  ;;  %v1229_v32 = vmul.f32 %v2100_v50, %v3044_v56 }
 0x22a   : > { %1465 = vmatmul.mubr.bf16.gmra.mrb[24].mxu1 %v1245_v40  ;;  %v1230_v21 = vmul.f32 %v2102_v35, %v3073_v16 }
 0x230   : > { %v2104_v42 = vpop.eup %2103 }
 0x231   : > { %v2106_v1 = vpop.eup %2105  ;;  %v1231_v57 = vmul.f32 %v2104_v42, %v3111_v46 }
 0x232   : > { %v1232_v14 = vmul.f32 %v2106_v1, %v3115_v63 }
 0x233   : > { %v1247_v23 = vpack.c.bf16 %v1231_v57, %v1229_v32 }
 0x234   : > { %v1248_v41 = vpack.c.bf16 %v1232_v14, %v1230_v21 }
 0x236   : > { %1472 = vmatprep.mubr.bf16.mxu1 %v1248_v41 }
 0x237   : > { %1473 = vmatmul.mubr.bf16.gmra.mrb[28].mxu1 %v1247_v23 }
 0x2cd   : > { %v1706_v43 = vpop.f32.mrb[0].mxu1 }
 0x2ce   : > { %v1707_v25 = vpop.f32.mrb[1].mxu1 }
 0x2cf   : > { %v1708_v49 = vadd.f32 %v1707_v25, %v1706_v43  ;;  %v1709_v56 = vpop.f32.mrb[2].mxu1 }
 0x2d0   : > { %v1710_v31 = vpop.f32.mrb[3].mxu1 }
 0x2d1   : > { %v1419_v46 = vadd.f32 %v1708_v49, %v3214_v53  ;;  %v1711_v59 = vadd.f32 %v1710_v31, %v1709_v56 }
 0x2d3   : > { %1481 = vst [vmem:[%s3219_s28] sm:$0xff] %v1419_v46  ;;  %v1422_v16 = vadd.f32 %v1711_v59, %v3214_v53 }
 0x2d5   : > { %1482 = vst [vmem:[%s3219_s28 + $0x8] sm:$0xff] %v1422_v16  ;;  %v1712_v63 = vpop.f32.mrb[4].mxu1 }
 0x2d6   : > { %v1713_v11 = vpop.f32.mrb[5].mxu1 }
 0x2d7   : > { %v1714_v24 = vadd.f32 %v1713_v11, %v1712_v63  ;;  %v1715_v58 = vpop.f32.mrb[6].mxu1 }
 0x2d8   : > { %v1716_v45 = vpop.f32.mrb[7].mxu1 }
 0x2d9   : > { %v1427_v27 = vadd.f32 %v1714_v24, %v3214_v53  ;;  %v1717_v54 = vadd.f32 %v1716_v45, %v1715_v58 }
 0x2db   : > { %1483 = vst [vmem:[%s3219_s28 + $0x10] sm:$0xff] %v1427_v27  ;;  %v1430_v4 = vadd.f32 %v1717_v54, %v3214_v53 }
 0x2dd   : > { %1484 = vst [vmem:[%s3219_s28 + $0x18] sm:$0xff] %v1430_v4  ;;  %v1718_v62 = vpop.f32.mrb[8].mxu1 }
 0x2de   : > { %v1719_v9 = vpop.f32.mrb[9].mxu1 }
 0x2df   : > { %v1720_v40 = vadd.f32 %v1719_v9, %v1718_v62  ;;  %v1721_v18 = vpop.f32.mrb[10].mxu1 }
 0x2e0   : > { %v1722_v28 = vpop.f32.mrb[11].mxu1 }
 0x2e1   : > { %v1435_v34 = vadd.f32 %v1720_v40, %v3214_v53  ;;  %v1723_v33 = vadd.f32 %v1722_v28, %v1721_v18 }
 0x2e3   : > { %1485 = vst [vmem:[%s3219_s28 + $0x20] sm:$0xff] %v1435_v34  ;;  %v1438_v26 = vadd.f32 %v1723_v33, %v3214_v53 }
 0x2e5   : > { %1486 = vst [vmem:[%s3219_s28 + $0x28] sm:$0xff] %v1438_v26  ;;  %v1724_v48 = vpop.f32.mrb[12].mxu1 }
 0x2e6   : > { %v1725_v15 = vpop.f32.mrb[13].mxu1 }
 0x2e7   : > { %v1726_v39 = vadd.f32 %v1725_v15, %v1724_v48  ;;  %v1727_v37 = vpop.f32.mrb[14].mxu1 }
 0x2e8   : > { %v1728_v17 = vpop.f32.mrb[15].mxu1 }
 0x2e9   : > { %v1443_v22 = vadd.f32 %v1726_v39, %v3214_v53  ;;  %v1729_v60 = vadd.f32 %v1728_v17, %v1727_v37 }
 0x2eb   : > { %1487 = vst [vmem:[%s3219_s28 + $0x30] sm:$0xff] %v1443_v22  ;;  %v1446_v13 = vadd.f32 %v1729_v60, %v3214_v53 }
 0x2ed   : > { %1488 = vst [vmem:[%s3219_s28 + $0x38] sm:$0xff] %v1446_v13  ;;  %v1730_v52 = vpop.f32.mrb[16].mxu1 }
 0x2ee   : > { %v1731_v61 = vpop.f32.mrb[17].mxu1 }
 0x2ef   : > { %v1732_v30 = vadd.f32 %v1731_v61, %v1730_v52  ;;  %v1733_v36 = vpop.f32.mrb[18].mxu1 }
 0x2f0   : > { %v1734_v2 = vpop.f32.mrb[19].mxu1 }
 0x2f1   : > { %v1451_v5 = vadd.f32 %v1732_v30, %v3214_v53  ;;  %v1735_v47 = vadd.f32 %v1734_v2, %v1733_v36 }
 0x2f3   : > { %1489 = vst [vmem:[%s3219_s28 + $0x40] sm:$0xff] %v1451_v5  ;;  %v1454_v8 = vadd.f32 %v1735_v47, %v3214_v53 }
 0x2f5   : > { %1490 = vst [vmem:[%s3219_s28 + $0x48] sm:$0xff] %v1454_v8  ;;  %v1736_v10 = vpop.f32.mrb[20].mxu1 }
 0x2f6   : > { %v1737_v55 = vpop.f32.mrb[21].mxu1 }
 0x2f7   : > { %v1738_v0 = vadd.f32 %v1737_v55, %v1736_v10  ;;  %v1739_v51 = vpop.f32.mrb[22].mxu1 }
 0x2f8   : > { %v1740_v29 = vpop.f32.mrb[23].mxu1 }
 0x2f9   : > { %v1459_v12 = vadd.f32 %v1738_v0, %v3214_v53  ;;  %v1741_v6 = vadd.f32 %v1740_v29, %v1739_v51 }
 0x2fb   : > { %1491 = vst [vmem:[%s3219_s28 + $0x50] sm:$0xff] %v1459_v12  ;;  %v1462_v3 = vadd.f32 %v1741_v6, %v3214_v53 }
 0x2fd   : > { %1492 = vst [vmem:[%s3219_s28 + $0x58] sm:$0xff] %v1462_v3  ;;  %v1742_v44 = vpop.f32.mrb[24].mxu1 }
 0x2fe   : > { %v1743_v38 = vpop.f32.mrb[25].mxu1 }
 0x2ff   : > { %v1744_v19 = vadd.f32 %v1743_v38, %v1742_v44  ;;  %v1745_v7 = vpop.f32.mrb[26].mxu1 }
 0x300   : > { %v1746_v20 = vpop.f32.mrb[27].mxu1 }
 0x301   : > { %v1467_v50 = vadd.f32 %v1744_v19, %v3214_v53  ;;  %v1747_v35 = vadd.f32 %v1746_v20, %v1745_v7 }
 0x303   : > { %1493 = vst [vmem:[%s3219_s28 + $0x60] sm:$0xff] %v1467_v50  ;;  %v1470_v42 = vadd.f32 %v1747_v35, %v3214_v53 }
 0x305   : > { %1494 = vst [vmem:[%s3219_s28 + $0x68] sm:$0xff] %v1470_v42 }
 0x30a   : > { %v1748_v1 = vpop.f32.mrb[28].mxu1 }
 0x30b   : > { %v1749_v32 = vpop.f32.mrb[29].mxu1 }
 0x30c   : > { %v1750_v57 = vadd.f32 %v1749_v32, %v1748_v1  ;;  %v1751_v21 = vpop.f32.mrb[30].mxu1 }
 0x30d   : > { %v1752_v14 = vpop.f32.mrb[31].mxu1 }
 0x30e   : > { %v1475_v23 = vadd.f32 %v1750_v57, %v3214_v53  ;;  %v1753_v41 = vadd.f32 %v1752_v14, %v1751_v21 }
 0x310   : > { %1495 = vst [vmem:[%s3219_s28 + $0x70] sm:$0xff] %v1475_v23  ;;  %v1478_v43 = vadd.f32 %v1753_v41, %v3214_v53 }
 0x312   : > { %1496 = vst [vmem:[%s3219_s28 + $0x78] sm:$0xff] %v1478_v43 }
 0x313   : > { %2206 = shalt.err (!%p2203_p1)
}
 0x314   : > { %s2207_s14 = scalar_lea.hbm %s3254_s12, 2048  ;;  %s2211_s15 = scalar_lea.hbm %s3308_s5, 4096 }
 0x315   : > { %p2208_p13 = scmp.ne.s32.totalorder %s3254_s12, %s2207_s14  ;;  %p2212_p4 = scmp.lt.u32.totalorder %s3254_s12, %s3308_s5 }
 0x316   : > { %p2213_p7 = scmp.lt.u32.totalorder %s2211_s15, %s2207_s14  ;;  %p2215_p11 = scmp.lt.u32.totalorder %s2207_s14, %s3254_s12 }
 0x317   : > { %p2209_p6 = pnand %p2208_p13, %p3397_p0 }
 0x318   : > { %p2214_p8 = por %p2213_p7, %p2212_p4 }
 0x319   : > { %p2210_p10 = pneg %p2209_p6 }
 0x31a   : > { %p2216_p2 = por %p2215_p11, %p2214_p8 }
 0x31c   : > { %p2217_p3 = pnand %p2216_p2, %p2210_p10 }
 0x31e   : > { %2220 = shalt.err (!%p2217_p3)
}
 0x31f   : > { %s2273_s13 = smov 128   ;;  %s2274_s11 = smov 8  }
 0x320   : > { %1764 = dma.vmem_to_hbm [thread:$0]  (%p3397_p0), %s3256_s17, 2048, %s3254_s12, %s1498_s22, %s2273_s13, %s2273_s13, %s2274_s11  }
 0x321 PF: > { %s1526_s29 = sand.u32 1, %s2251_s18   ;;  %p3398_p5 = scmp.ne.s32.totalorder %s3313_s25, 0 }
 0x322   : > { %p3399_p9 = scmp.ge.s32.totalorder %s2263_s21, 2  ;;  %s1527_s30 = scalar_lea.sflag [#allocation4], %s1526_s29 }
 0x324   : > { %p1778_p12 = pnand %p3399_p9, %p3398_p5 }
 0x326   : > { %2246 = dma.done.wait (!%p1778_p12), %s1527_s30, 2048  }
 0x327   : > { %2248 = vsyncadd (!%p1778_p12), %s1527_s30, 4294965248  ;;  %p19_p1 = scmp.ge.s32.totalorder %s2418_s23, 4   ;;  %s3400_s18 = smov %s2255_s19 }
 0x328   : > { %s3401_s19 = smov %s2259_s20  ;;  %s3402_s20 = smov %s2427_s7 }
 0x329   : > { %s3403_s21 = smov %s2418_s23  ;;  %21 = sbr.rel (!%p19_p1) target bundleno = 6 (0x6), region = 93 }
 0x330   :  { %1532 = vsyncpa [#allocation3], 1 }
 0x331   :  { %1534 = vsyncpa [#allocation3 + $0x1], 1 }
 0x332   :  { %1535 = vsyncpa [#allocation6], 1 }
 0x333   :  { %1536 = vsyncpa [#allocation4], 1 }
 0x334   :  { %1538 = vsyncpa [#allocation4 + $0x1], 1 }

</bundles_post_ra>
